<compile_context>
chip_gen: v6e
topology: v6e:2x2x1
jax: 0.10.0
libtpu: 0.0.40
codegen_flags: <defaults>
</compile_context>

<pallas_src>
import functools

import jax
import jax.numpy as jnp
from jax.experimental import pallas as pl
from jax.experimental.pallas import tpu as pltpu

D_IN, D1, D2, D3 = 2103, 256, 128, 2


def mlp_kernel(x_ref, w1_ref, w2_ref, w3_ref, b_ref, o_ref):
    # Native bf16 MXU operands on both sides, f32 accumulation.
    x = x_ref[...].astype(jnp.bfloat16)                     # (TB, D_IN) bf16

    # fc1 + ReLU
    h1 = jnp.dot(x, w1_ref[...], preferred_element_type=jnp.float32)
    h1 = jnp.maximum(h1 + b_ref[:, :D1], 0.0)

    # fc2 + ReLU
    h2 = jnp.dot(h1.astype(jnp.bfloat16), w2_ref[...],
                 preferred_element_type=jnp.float32)
    h2 = jnp.maximum(h2 + b_ref[:, D1:D1 + D2], 0.0)

    # fc3 (no activation)
    out = jnp.dot(h2.astype(jnp.bfloat16), w3_ref[...],
                  preferred_element_type=jnp.float32)
    o_ref[...] = (out + b_ref[:, D1 + D2:D1 + D2 + D3]).astype(o_ref.dtype)


def _round_up(n, m):
    return ((n + m - 1) // m) * m


def _tile_rows(B, tb):
    """Batch tile: <= tb, always a multiple of 8 sublanes, and 128-aligned
    (full MXU passes on v5e) whenever the batch is large enough."""
    t = min(tb, _round_up(B, 8))
    if t >= 128:
        t = (t // 128) * 128
    return t


@functools.partial(jax.jit, static_argnames=("tb",))
def net_forward(x, params, *, tb=512):
    """x: (B, 2103) f32 (or bf16 — no wrapper-side cast is added either way).

    params = (w1_bf16, w2_bf16, w3_bf16, bias_packed_f32).
    """
    w1, w2, w3, b = params
    B = x.shape[0]
    tb_eff = _tile_rows(B, tb)

    return pl.pallas_call(
        mlp_kernel,
        out_shape=jax.ShapeDtypeStruct((B, D3), jnp.float32),
        grid=(pl.cdiv(B, tb_eff),),   # ragged last block handled by Pallas
        in_specs=[
            pl.BlockSpec((tb_eff, D_IN), lambda i: (i, 0)),      # x tile (pipelined)
            pl.BlockSpec((D_IN, D1), lambda i: (0, 0)),          # W1 (VMEM-resident)
            pl.BlockSpec((D1, D2), lambda i: (0, 0)),            # W2 (VMEM-resident)
            pl.BlockSpec((D2, D3), lambda i: (0, 0)),            # W3 (VMEM-resident)
            pl.BlockSpec((1, D1 + D2 + D3), lambda i: (0, 0)),   # packed biases
        ],
        out_specs=pl.BlockSpec((tb_eff, D3), lambda i: (i, 0)),
        compiler_params=pltpu.CompilerParams(
            dimension_semantics=("parallel",)),
    )(x, w1, w2, w3, b)


def init_params(key):
    """PyTorch Linear default init (U[-1/sqrt(fan_in), 1/sqrt(fan_in)]).

    Weights are stored as (in, out) in bf16 (HBM/MXU format); biases are kept
    f32 and packed into one (1, 256+128+2) array.
    """
    dims = [(D_IN, D1), (D1, D2), (D2, D3)]
    ws, bs = [], []
    for fan_in, fan_out in dims:
        kw, kb, key = jax.random.split(key, 3)
        bound = 1.0 / jnp.sqrt(float(fan_in))
        w = jax.random.uniform(kw, (fan_in, fan_out), jnp.float32, -bound, bound)
        b = jax.random.uniform(kb, (1, fan_out), jnp.float32, -bound, bound)
        ws.append(w.astype(jnp.bfloat16))
        bs.append(b)
    bias = jnp.concatenate(bs, axis=1)  # (1, D1 + D2 + D3)
    return (ws[0], ws[1], ws[2], bias)


def reference_forward(x, params):
    """Pure-JAX reference matching the kernel math (bf16 MXU operands, f32 acc)."""
    w1, w2, w3, b = params
    b1 = b[:, :D1]
    b2 = b[:, D1:D1 + D2]
    b3 = b[:, D1 + D2:D1 + D2 + D3]

    def bdot(a, w):
        return jnp.dot(a.astype(jnp.bfloat16), w,
                       preferred_element_type=jnp.float32)

    h1 = jnp.maximum(bdot(x, w1) + b1, 0.0)
    h2 = jnp.maximum(bdot(h1, w2) + b2, 0.0)
    return bdot(h2, w3) + b3


if __name__ == "__main__":
    key = jax.random.PRNGKey(0)
    kx, kp = jax.random.split(key)
    params = init_params(kp)

    # B=16: single exact block (block == array).  B=200: exercises the cdiv
    # grid with a ragged (partially out-of-bounds) last block.
    for B in (16, 200):
        x = jax.random.normal(jax.random.fold_in(kx, B), (B, D_IN), jnp.float32)
        out = jax.block_until_ready(net_forward(x, params))
        ref = reference_forward(x, params)
        assert out.shape == (B, D3), out.shape
        # bf16 operands -> tolerance loosened vs the old f32-activation check;
        # only accumulation-order differences remain between kernel and ref.
        assert jnp.allclose(out, ref, atol=5e-3, rtol=5e-3), f"mismatch at B={B}"

    print("KERNEL_OK")
</pallas_src>

<mosaic_0001>
module attributes {stable_mosaic.version = 11 : i64} {
  func.func @mlp_kernel(%arg0: i32, %arg1: memref<16x2103xf32, #tpu.memory_space<vmem>>, %arg2: memref<2103x256xbf16, #tpu.memory_space<vmem>>, %arg3: memref<256x128xbf16, #tpu.memory_space<vmem>>, %arg4: memref<128x2xbf16, #tpu.memory_space<vmem>>, %arg5: memref<1x386xf32, #tpu.memory_space<vmem>>, %arg6: memref<16x2xf32, #tpu.memory_space<vmem>>) attributes {dimension_semantics = [#tpu.dimension_semantics<parallel>], iteration_bounds = array<i64: 1>, scalar_prefetch = 0 : i64, scratch_operands = 0 : i64, tpu.core_type = #tpu.core_type<tc>, window_params = [{transform_indices = @transform_0, window_bounds = array<i64: 16, 2103>}, {pipeline_mode = #tpu.pipeline_mode<synchronous>, transform_indices = @transform_1, window_bounds = array<i64: 2103, 256>}, {pipeline_mode = #tpu.pipeline_mode<synchronous>, transform_indices = @transform_2, window_bounds = array<i64: 256, 128>}, {pipeline_mode = #tpu.pipeline_mode<synchronous>, transform_indices = @transform_3, window_bounds = array<i64: 128, 2>}, {pipeline_mode = #tpu.pipeline_mode<synchronous>, transform_indices = @transform_4, window_bounds = array<i64: 1, 386>}, {transform_indices = @transform_5, window_bounds = array<i64: 16, 2>}]} {
    %c0 = arith.constant 0 : index
    %c0_0 = arith.constant 0 : index
    %0 = vector.load %arg1[%c0, %c0_0] : memref<16x2103xf32, #tpu.memory_space<vmem>>, vector<16x2103xf32>
    %1 = arith.truncf %0 : vector<16x2103xf32> to vector<16x2103xbf16>
    %c0_1 = arith.constant 0 : index
    %c0_2 = arith.constant 0 : index
    %2 = vector.load %arg2[%c0_1, %c0_2] : memref<2103x256xbf16, #tpu.memory_space<vmem>>, vector<2103x256xbf16>
    %cst = arith.constant dense<0.000000e+00> : vector<16x256xf32>
    %3 = tpu.matmul %1, %2, %cst {dimension_numbers = #tpu.dot_dimension_numbers<[1], [0], [0], [1], [0, 0, 1, 1], [], []>} : vector<16x2103xbf16>, vector<2103x256xbf16>, vector<16x256xf32> -> vector<16x256xf32>
    %c0_3 = arith.constant 0 : index
    %c0_4 = arith.constant 0 : index
    %4 = vector.load %arg5[%c0_3, %c0_4] : memref<1x386xf32, #tpu.memory_space<vmem>>, vector<1x256xf32>
    %5 = vector.broadcast %4 : vector<1x256xf32> to vector<16x256xf32>
    %6 = arith.addf %3, %5 : vector<16x256xf32>
    %cst_5 = arith.constant 0.000000e+00 : f32
    %7 = vector.broadcast %cst_5 : f32 to vector<16x256xf32>
    %8 = arith.maximumf %6, %7 : vector<16x256xf32>
    %9 = arith.truncf %8 : vector<16x256xf32> to vector<16x256xbf16>
    %c0_6 = arith.constant 0 : index
    %c0_7 = arith.constant 0 : index
    %10 = vector.load %arg3[%c0_6, %c0_7] : memref<256x128xbf16, #tpu.memory_space<vmem>>, vector<256x128xbf16>
    %cst_8 = arith.constant dense<0.000000e+00> : vector<16x128xf32>
    %11 = tpu.matmul %9, %10, %cst_8 {dimension_numbers = #tpu.dot_dimension_numbers<[1], [0], [0], [1], [0, 0, 1, 1], [], []>} : vector<16x256xbf16>, vector<256x128xbf16>, vector<16x128xf32> -> vector<16x128xf32>
    %c0_9 = arith.constant 0 : index
    %c256 = arith.constant 256 : index
    %12 = vector.load %arg5[%c0_9, %c256] : memref<1x386xf32, #tpu.memory_space<vmem>>, vector<1x128xf32>
    %13 = vector.broadcast %12 : vector<1x128xf32> to vector<16x128xf32>
    %14 = arith.addf %11, %13 : vector<16x128xf32>
    %cst_10 = arith.constant 0.000000e+00 : f32
    %15 = vector.broadcast %cst_10 : f32 to vector<16x128xf32>
    %16 = arith.maximumf %14, %15 : vector<16x128xf32>
    %17 = arith.truncf %16 : vector<16x128xf32> to vector<16x128xbf16>
    %c0_11 = arith.constant 0 : index
    %c0_12 = arith.constant 0 : index
    %18 = vector.load %arg4[%c0_11, %c0_12] : memref<128x2xbf16, #tpu.memory_space<vmem>>, vector<128x2xbf16>
    %cst_13 = arith.constant dense<0.000000e+00> : vector<16x2xf32>
    %19 = tpu.matmul %17, %18, %cst_13 {dimension_numbers = #tpu.dot_dimension_numbers<[1], [0], [0], [1], [0, 0, 1, 1], [], []>} : vector<16x128xbf16>, vector<128x2xbf16>, vector<16x2xf32> -> vector<16x2xf32>
    %c0_14 = arith.constant 0 : index
    %c384 = arith.constant 384 : index
    %20 = vector.load %arg5[%c0_14, %c384] : memref<1x386xf32, #tpu.memory_space<vmem>>, vector<1x2xf32>
    %21 = vector.broadcast %20 : vector<1x2xf32> to vector<16x2xf32>
    %22 = arith.addf %19, %21 : vector<16x2xf32>
    %c0_15 = arith.constant 0 : index
    %c0_16 = arith.constant 0 : index
    %23 = vector.load %arg6[%c0_15, %c0_16] : memref<16x2xf32, #tpu.memory_space<vmem>>, vector<16x2xf32>
    tpu.vector_store %arg6[%c0_15, %c0_16], %22 {strides = array<i32>} : memref<16x2xf32, #tpu.memory_space<vmem>>, vector<16x2xf32>,
    return
  }
  func.func @transform_0(%arg0: i32) -> (i32, i32) {
    %c0_i32 = arith.constant 0 : i32
    %c0_i32_0 = arith.constant 0 : i32
    return %arg0, %c0_i32 : i32, i32
  }
  func.func @transform_1(%arg0: i32) -> (i32, i32) {
    %c0_i32 = arith.constant 0 : i32
    %c0_i32_0 = arith.constant 0 : i32
    %c0_i32_1 = arith.constant 0 : i32
    return %c0_i32, %c0_i32_0 : i32, i32
  }
  func.func @transform_2(%arg0: i32) -> (i32, i32) {
    %c0_i32 = arith.constant 0 : i32
    %c0_i32_0 = arith.constant 0 : i32
    %c0_i32_1 = arith.constant 0 : i32
    return %c0_i32, %c0_i32_0 : i32, i32
  }
  func.func @transform_3(%arg0: i32) -> (i32, i32) {
    %c0_i32 = arith.constant 0 : i32
    %c0_i32_0 = arith.constant 0 : i32
    %c0_i32_1 = arith.constant 0 : i32
    return %c0_i32, %c0_i32_0 : i32, i32
  }
  func.func @transform_4(%arg0: i32) -> (i32, i32) {
    %c0_i32 = arith.constant 0 : i32
    %c0_i32_0 = arith.constant 0 : i32
    %c0_i32_1 = arith.constant 0 : i32
    return %c0_i32, %c0_i32_0 : i32, i32
  }
  func.func @transform_5(%arg0: i32) -> (i32, i32) {
    %c0_i32 = arith.constant 0 : i32
    %c0_i32_0 = arith.constant 0 : i32
    return %arg0, %c0_i32 : i32, i32
  }
}

</mosaic_0001>

<bundles_post_ra>
// kernel: net_forward.1
= control target key start
LH: loop header
LB: loop body
LE: loop exit
PB: predicated region body
PF: predicated region fallthrough
CT: control target
= control target key end

     0   :  { %10 = vsyncpa [#allocation3], 0  ;;  %s3379_s0 = inlined_call_operand.hbm [shape: f32[16,2103], index: 0, kind: input, shape index: {}]   ;;  %s3380_s1 = inlined_call_operand.hbm [shape: bf16[2103,256], index: 1, kind: input, shape index: {}]   ;;  %s3381_s2 = inlined_call_operand.hbm [shape: bf16[256,128], index: 2, kind: input, shape index: {}]   ;;  %s3382_s3 = inlined_call_operand.vmem [shape: bf16[128,2], index: 3, kind: input, shape index: {}]   ;;  %s3383_s4 = inlined_call_operand.hbm [shape: f32[1,386], index: 4, kind: input, shape index: {}]   ;;  %s3384_s5 = inlined_call_operand.vmem [shape: f32[16,2], index: 5, kind: output, shape index: {}]  }
   0x1   :  { %11 = vsyncpa [#allocation5], 0 }
   0x2   :  { %12 = vsyncpa [#allocation8], 0  ;;  %s3284_s18 = smov [#allocation4]  }
   0x3   :  { %s30_s19 = sshll.u32 %s3284_s18, 4  ;;  %s31_s19 = int_to_ptr.vmem [resolvable:$true] %s30_s19 }
   0x4   :  { %s3206_s20 = scalar_lea.vmem %s31_s19, 33664  ;;  %p3211_p1 = scmp.lt.s32.totalorder %s31_s19, %s31_s19 }
   0x5   :  { %p3207_p0 = scmp.ne.s32.totalorder %s31_s19, %s3206_s20  ;;  %p3212_p2 = scmp.lt.s32.totalorder %s3206_s20, %s3206_s20 }
   0x7   :  { %p3213_p3 = por %p3212_p2, %p3211_p1 }
   0x9   :  { %p3214_p4 = pnand %p3213_p3, %p3207_p0 }
   0xb   :  { %3217 = shalt.err (!%p3214_p4)
}
   0xc   :  { %s3285_s21 = smov 128   ;;  %s3286_s22 = smov 8  }
   0xd   :  { %36 = dma.hbm_to_vmem [thread:$0]  %s3380_s1, 33664, %s31_s19, [#allocation5], %s3285_s21, %s3285_s21, %s3286_s22  }
   0xe   :  { %s3287_s25 = smov [#allocation2]  }
   0xf   :  { %s18_s26 = sshll.u32 %s3287_s25, 4  ;;  %s19_s26 = int_to_ptr.vmem [resolvable:$true] %s18_s26 }
  0x10   :  { %s3226_s27 = scalar_lea.vmem %s19_s26, 4352  ;;  %p3231_p6 = scmp.lt.s32.totalorder %s19_s26, %s19_s26 }
  0x11   :  { %p3227_p5 = scmp.ne.s32.totalorder %s19_s26, %s3226_s27  ;;  %p3232_p7 = scmp.lt.s32.totalorder %s3226_s27, %s3226_s27 }
  0x13   :  { %p3233_p8 = por %p3232_p7, %p3231_p6 }
  0x15   :  { %p3234_p9 = pnand %p3233_p8, %p3227_p5 }
  0x17   :  { %3237 = shalt.err (!%p3234_p9)
}
  0x18   :  { %s3288_s28 = smov 2176   ;;  %s3289_s29 = smov 136  }
  0x19   :  { %24 = dma.hbm_to_vmem [thread:$0]  %s3379_s0, 4352, %s19_s26, [#allocation3], %s3288_s28, %s3288_s28, %s3289_s29  }
  0x1a   :  { %s3290_s7 = smov [#allocation6]  }
  0x1b   :  { %s42_s8 = sshll.u32 %s3290_s7, 4  ;;  %s43_s8 = int_to_ptr.vmem [resolvable:$true] %s42_s8 }
  0x1c   :  { %s3246_s1 = scalar_lea.vmem %s43_s8, 2048  ;;  %p3251_p11 = scmp.lt.s32.totalorder %s43_s8, %s43_s8 }
  0x1d   :  { %p3247_p10 = scmp.ne.s32.totalorder %s43_s8, %s3246_s1  ;;  %p3252_p12 = scmp.lt.s32.totalorder %s3246_s1, %s3246_s1 }
  0x1f   :  { %p3253_p13 = por %p3252_p12, %p3251_p11 }
  0x21   :  { %p3254_p0 = pnand %p3253_p13, %p3247_p10 }
  0x23   :  { %3257 = shalt.err (!%p3254_p0)
}
  0x24   :  { %s3291_s9 = smov 64   ;;  %s3292_s10 = smov 4  }
  0x25   :  { %48 = dma.hbm_to_vmem [thread:$0]  %s3381_s2, 2048, %s43_s8, [#allocation5], %s3291_s9, %s3291_s9, %s3292_s10  }
  0x26   :  { %s3293_s13 = smov [#allocation7]  }
  0x27   :  { %s57_s14 = sshll.u32 %s3293_s13, 4  ;;  %s58_s14 = int_to_ptr.vmem [resolvable:$true] %s57_s14 }
  0x28   :  { %s3266_s0 = scalar_lea.vmem %s58_s14, 64  ;;  %p3271_p2 = scmp.lt.s32.totalorder %s58_s14, %s58_s14 }
  0x29   :  { %p3267_p1 = scmp.ne.s32.totalorder %s58_s14, %s3266_s0  ;;  %p3272_p3 = scmp.lt.s32.totalorder %s3266_s0, %s3266_s0 }
  0x2b   :  { %p3273_p4 = por %p3272_p3, %p3271_p2 }
  0x2d   :  { %p3274_p5 = pnand %p3273_p4, %p3267_p1 }
  0x2f   :  { %3277 = shalt.err (!%p3274_p5)
}
  0x30   :  { %60 = dma.hbm_to_vmem [thread:$0]  %s3383_s4, 64, %s58_s14, [#allocation8]  }
  0x31   :  { %3278 = dma.done.wait [#allocation3], 4352  }
  0x32   :  { %3279 = vsyncadd [#allocation3], 4294962944 }
  0x33   :  { %3280 = dma.done.wait [#allocation5], 35712  }
  0x34   :  { %3281 = vsyncadd [#allocation5], 4294931584 }
  0x35   :  { %3282 = dma.done.wait [#allocation8], 64  }
  0x36   :  { %3283 = vsyncadd [#allocation8], 4294967232  ;;  %v2779_v0 = vld [vmem:[#allocation4 + $0x74] ss:$8 sps:$4 sm:$0xff]   ;;  %v2781_v1 = vld [vmem:[#allocation4 + $0x70] ss:$8 sps:$4 sm:$0xff]  }
  0x37   :  { %1729 = vmatprep.subr.bf16.mxu0 %v2779_v0  ;;  %v2782_v2 = vld [vmem:[#allocation4 + $0x174] ss:$8 sps:$4 sm:$0xff]   ;;  %v2784_v3 = vld [vmem:[#allocation4 + $0x170] ss:$8 sps:$4 sm:$0xff]   ;;  %v2785_v4 = vld [vmem:[#allocation4 + $0x64] ss:$8 sps:$4 sm:$0xff]  }
  0x38   :  { %1730 = vmatpush1.bf16.msra.mxu0 %v2781_v1  ;;  %v2787_v5 = vld [vmem:[#allocation4 + $0x60] ss:$8 sps:$4 sm:$0xff]   ;;  %1772 = vmatprep.subr.bf16.mxu1 %v2782_v2  ;;  %v2788_v6 = vld [vmem:[#allocation4 + $0x164] ss:$8 sps:$4 sm:$0xff]   ;;  %v2791_v8 = vld [vmem:[#allocation4 + $0x54] ss:$8 sps:$4 sm:$0xff]  }
  0x39   :  { %1773 = vmatpush1.bf16.msra.mxu1 %v2784_v3  ;;  %1731 = vmatprep.subr.bf16.mxu0 %v2785_v4  ;;  %v2790_v7 = vld [vmem:[#allocation4 + $0x160] ss:$8 sps:$4 sm:$0xff]   ;;  %v2793_v9 = vld [vmem:[#allocation4 + $0x50] ss:$8 sps:$4 sm:$0xff]   ;;  %v2794_v10 = vld [vmem:[#allocation4 + $0x154] ss:$8 sps:$4 sm:$0xff]  }
  0x3a   :  { %1774 = vmatprep.subr.bf16.mxu1 %v2788_v6  ;;  %v2797_v11 = vld [vmem:[#allocation4 + $0x44] ss:$8 sps:$4 sm:$0xff]   ;;  %v2796_v12 = vld [vmem:[#allocation4 + $0x150] ss:$8 sps:$4 sm:$0xff]   ;;  %v2799_v14 = vld [vmem:[#allocation4 + $0x40] ss:$8 sps:$4 sm:$0xff]  }
  0x3b   :  { %v2800_v13 = vld [vmem:[#allocation4 + $0x144] ss:$8 sps:$4 sm:$0xff]   ;;  %v2803_v15 = vld [vmem:[#allocation4 + $0x34] ss:$8 sps:$4 sm:$0xff]   ;;  %v2802_v16 = vld [vmem:[#allocation4 + $0x140] ss:$8 sps:$4 sm:$0xff]  }
  0x3c   :  { %1732 = vmatpush1.bf16.msra.mxu0 %v2787_v5  ;;  %v2806_v17 = vld [vmem:[#allocation4 + $0x134] ss:$8 sps:$4 sm:$0xff]   ;;  %v2805_v18 = vld [vmem:[#allocation4 + $0x30] ss:$8 sps:$4 sm:$0xff]   ;;  %v2809_v19 = vld [vmem:[#allocation4 + $0x24] ss:$8 sps:$4 sm:$0xff]  }
  0x3d   :  { %1733 = vmatprep.subr.bf16.mxu0 %v2791_v8  ;;  %1775 = vmatpush1.bf16.msra.mxu1 %v2790_v7  ;;  %v2808_v20 = vld [vmem:[#allocation4 + $0x130] ss:$8 sps:$4 sm:$0xff]   ;;  %v2812_v21 = vld [vmem:[#allocation4 + $0x124] ss:$8 sps:$4 sm:$0xff]   ;;  %v2811_v22 = vld [vmem:[#allocation4 + $0x20] ss:$8 sps:$4 sm:$0xff]  }
  0x3e   :  { %1776 = vmatprep.subr.bf16.mxu1 %v2794_v10  ;;  %v2815_v23 = vld [vmem:[#allocation4 + $0x14] ss:$8 sps:$4 sm:$0xff]   ;;  %v2814_v24 = vld [vmem:[#allocation4 + $0x120] ss:$8 sps:$4 sm:$0xff]   ;;  %v2817_v26 = vld [vmem:[#allocation4 + $0x10] ss:$8 sps:$4 sm:$0xff]  }
  0x3f   :  { %v2818_v25 = vld [vmem:[#allocation4 + $0x114] ss:$8 sps:$4 sm:$0xff]   ;;  %v2821_v27 = vld [vmem:[#allocation4 + $0x4] ss:$8 sps:$4 sm:$0xff]   ;;  %v2820_v28 = vld [vmem:[#allocation4 + $0x110] ss:$8 sps:$4 sm:$0xff]  }
  0x40   :  { %1734 = vmatpush1.bf16.msra.mxu0 %v2793_v9  ;;  %v2824_v29 = vld [vmem:[#allocation4 + $0x104] ss:$8 sps:$4 sm:$0xff]   ;;  %v2823_v30 = vld [vmem:[#allocation4] ss:$8 sps:$4 sm:$0xff]   ;;  %v2827_v31 = vld [vmem:[#allocation4 + $0xf4] ss:$8 sps:$4 sm:$0xff]  }
  0x41   :  { %1735 = vmatprep.subr.bf16.mxu0 %v2797_v11  ;;  %1777 = vmatpush1.bf16.msra.mxu1 %v2796_v12  ;;  %v2826_v32 = vld [vmem:[#allocation4 + $0x100] ss:$8 sps:$4 sm:$0xff]   ;;  %v2830_v33 = vld [vmem:[#allocation4 + $0x1f4] ss:$8 sps:$4 sm:$0xff]   ;;  %v2829_v34 = vld [vmem:[#allocation4 + $0xf0] ss:$8 sps:$4 sm:$0xff]  }
  0x42   :  { %1778 = vmatprep.subr.bf16.mxu1 %v2800_v13  ;;  %v2833_v35 = vld [vmem:[#allocation4 + $0xe4] ss:$8 sps:$4 sm:$0xff]   ;;  %v2832_v36 = vld [vmem:[#allocation4 + $0x1f0] ss:$8 sps:$4 sm:$0xff]   ;;  %v2835_v38 = vld [vmem:[#allocation4 + $0xe0] ss:$8 sps:$4 sm:$0xff]  }
  0x43   :  { %v2836_v37 = vld [vmem:[#allocation4 + $0x1e4] ss:$8 sps:$4 sm:$0xff]   ;;  %v2839_v39 = vld [vmem:[#allocation4 + $0xd4] ss:$8 sps:$4 sm:$0xff]   ;;  %v2838_v40 = vld [vmem:[#allocation4 + $0x1e0] ss:$8 sps:$4 sm:$0xff]  }
  0x44   :  { %1736 = vmatpush1.bf16.msra.mxu0 %v2799_v14  ;;  %v2842_v41 = vld [vmem:[#allocation4 + $0x1d4] ss:$8 sps:$4 sm:$0xff]   ;;  %v2841_v42 = vld [vmem:[#allocation4 + $0xd0] ss:$8 sps:$4 sm:$0xff]   ;;  %v2845_v43 = vld [vmem:[#allocation4 + $0xc4] ss:$8 sps:$4 sm:$0xff]  }
  0x45   :  { %1737 = vmatprep.subr.bf16.mxu0 %v2803_v15  ;;  %1779 = vmatpush1.bf16.msra.mxu1 %v2802_v16  ;;  %v2844_v44 = vld [vmem:[#allocation4 + $0x1d0] ss:$8 sps:$4 sm:$0xff]   ;;  %v2848_v45 = vld [vmem:[#allocation4 + $0x1c4] ss:$8 sps:$4 sm:$0xff]   ;;  %v2847_v48 = vld [vmem:[#allocation4 + $0xc0] ss:$8 sps:$4 sm:$0xff]  }
  0x46   :  { %1780 = vmatprep.subr.bf16.mxu1 %v2806_v17  ;;  %v75_v46 = vld [vmem:[#allocation2 + $0x8] sm:$0xff]  ;;  %v92_v47 = vld [vmem:[#allocation2 + $0x90] sm:$0xff]  ;;  %v77_v52 = vld [vmem:[#allocation2 + $0x18] sm:$0xff]  ;;  %vm1719_vm0 = vcmask 1042432   ;;  %vm1720_vm1 = vcmask 1043456   ;;  %vm1715_vm2 = vcmask 449536  }
  0x47   :  { %v109_v49 = vpack.c.bf16 %v92_v47, %v75_v46  ;;  %v2851_v50 = vld [vmem:[#allocation4 + $0xb4] ss:$8 sps:$4 sm:$0xff]   ;;  %v2850_v51 = vld [vmem:[#allocation4 + $0x1c0] ss:$8 sps:$4 sm:$0xff]   ;;  %v2853_v56 = vld [vmem:[#allocation4 + $0xb0] ss:$8 sps:$4 sm:$0xff]  }
  0x48   :  { %1738 = vmatpush1.bf16.msra.mxu0 %v2805_v18  ;;  %v94_v53 = vld [vmem:[#allocation2 + $0xa0] sm:$0xff]  ;;  %v2857_v57 = vld [vmem:[#allocation4 + $0xa4] ss:$8 sps:$4 sm:$0xff]   ;;  %v2859_v60 = vld [vmem:[#allocation4 + $0xa0] ss:$8 sps:$4 sm:$0xff]   ;;  %vm3297_vm3 = vmmov 0  }
  0x49   :  { %1739 = vmatprep.subr.bf16.mxu0 %v2809_v19  ;;  %1781 = vmatpush1.bf16.msra.mxu1 %v2808_v20  ;;  %v2854_v54 = vld [vmem:[#allocation4 + $0x1b4] ss:$8 sps:$4 sm:$0xff]   ;;  %v111_v55 = vpack.c.bf16 %v94_v53, %v77_v52  ;;  %v2856_v58 = vld [vmem:[#allocation4 + $0x1b0] ss:$8 sps:$4 sm:$0xff]   ;;  %v2860_v59 = vld [vmem:[#allocation4 + $0x1a4] ss:$8 sps:$4 sm:$0xff]  }
  0x4a   :  { %1782 = vmatprep.subr.bf16.mxu1 %v2812_v21  ;;  %1761 = vmatprep.mubr.bf16.mxu0 %v109_v49  ;;  %v2863_v61 = vld [vmem:[#allocation4 + $0x94] ss:$8 sps:$4 sm:$0xff]   ;;  %v2862_v62 = vld [vmem:[#allocation4 + $0x1a0] ss:$8 sps:$4 sm:$0xff]   ;;  %v2865_v0 = vld [vmem:[#allocation4 + $0x90] ss:$8 sps:$4 sm:$0xff]  }
  0x4b   :  { %1804 = vmatprep.mubr.bf16.mxu1 %v111_v55  ;;  %v2866_v63 = vld [vmem:[#allocation4 + $0x194] ss:$8 sps:$4 sm:$0xff]   ;;  %v2868_v1 = vld [vmem:[#allocation4 + $0x190] ss:$8 sps:$4 sm:$0xff]   ;;  %v2869_v2 = vld [vmem:[#allocation4 + $0x84] ss:$8 sps:$4 sm:$0xff]  }
  0x4c   :  { %1740 = vmatpush1.bf16.msra.mxu0 %v2811_v22  ;;  %v2871_v3 = vld [vmem:[#allocation4 + $0x80] ss:$8 sps:$4 sm:$0xff]   ;;  %v2872_v4 = vld [vmem:[#allocation4 + $0x184] ss:$8 sps:$4 sm:$0xff]   ;;  %v74_v5 = vld [vmem:[#allocation2] sm:$0xff]  ;;  %vm2413_vm4 = vcmask 15360  }
  0x4d   :  { %1741 = vmatprep.subr.bf16.mxu0 %v2815_v23  ;;  %1783 = vmatpush1.bf16.msra.mxu1 %v2814_v24  ;;  %v2874_v6 = vld [vmem:[#allocation4 + $0x180] ss:$8 sps:$4 sm:$0xff]   ;;  %v91_v7 = vld [vmem:[#allocation2 + $0x88] sm:$0xff]  ;;  %v2883_v15 = vld [vmem:[#allocation4 + $0x264] ss:$8 sps:$4 sm:$0xff]  }
  0x4e   :  { %1784 = vmatprep.subr.bf16.mxu1 %v2818_v25  ;;  %v2877_v8 = vld [vmem:[#allocation4 + $0x274] ss:$8 sps:$4 sm:$0xff]   ;;  %v76_v9 = vld [vmem:[#allocation2 + $0x10] sm:$0xff]  ;;  %v93_v10 = vld [vmem:[#allocation2 + $0x98] sm:$0xff]  ;;  %v108_v11 = vpack.c.bf16 %v91_v7, %v74_v5 }
  0x4f   :  { %v2880_v12 = vld [vmem:[#allocation4 + $0x374] ss:$8 sps:$4 sm:$0xff]   ;;  %v2875_v13 = vld [vmem:[#allocation4 + $0x270] ss:$8 sps:$4 sm:$0xff]   ;;  %v110_v14 = vpack.c.bf16 %v93_v10, %v76_v9  ;;  %v2886_v17 = vld [vmem:[#allocation4 + $0x364] ss:$8 sps:$4 sm:$0xff]  }
  0x50   :  { %1742 = vmatpush1.bf16.msra.mxu0 %v2817_v26  ;;  %v2878_v16 = vld [vmem:[#allocation4 + $0x370] ss:$8 sps:$4 sm:$0xff]   ;;  %v2881_v18 = vld [vmem:[#allocation4 + $0x260] ss:$8 sps:$4 sm:$0xff]   ;;  %v2889_v19 = vld [vmem:[#allocation4 + $0x254] ss:$8 sps:$4 sm:$0xff]  }
  0x51   :  { %1743 = vmatprep.subr.bf16.mxu0 %v2821_v27  ;;  %1785 = vmatpush1.bf16.msra.mxu1 %v2820_v28  ;;  %v2884_v20 = vld [vmem:[#allocation4 + $0x360] ss:$8 sps:$4 sm:$0xff]   ;;  %v2892_v21 = vld [vmem:[#allocation4 + $0x354] ss:$8 sps:$4 sm:$0xff]   ;;  %v2887_v22 = vld [vmem:[#allocation4 + $0x250] ss:$8 sps:$4 sm:$0xff]  }
  0x52   :  { %1786 = vmatprep.subr.bf16.mxu1 %v2824_v29  ;;  %v2895_v23 = vld [vmem:[#allocation4 + $0x244] ss:$8 sps:$4 sm:$0xff]   ;;  %v2890_v24 = vld [vmem:[#allocation4 + $0x350] ss:$8 sps:$4 sm:$0xff]   ;;  %v2893_v26 = vld [vmem:[#allocation4 + $0x240] ss:$8 sps:$4 sm:$0xff]  }
  0x53   :  { %v2898_v25 = vld [vmem:[#allocation4 + $0x344] ss:$8 sps:$4 sm:$0xff]   ;;  %v2901_v27 = vld [vmem:[#allocation4 + $0x234] ss:$8 sps:$4 sm:$0xff]   ;;  %v2896_v28 = vld [vmem:[#allocation4 + $0x340] ss:$8 sps:$4 sm:$0xff]  }
  0x54   :  { %1744 = vmatpush1.bf16.msra.mxu0 %v2823_v30  ;;  %v2904_v29 = vld [vmem:[#allocation4 + $0x334] ss:$8 sps:$4 sm:$0xff]   ;;  %v2899_v30 = vld [vmem:[#allocation4 + $0x230] ss:$8 sps:$4 sm:$0xff]   ;;  %v2917_v46 = vld [vmem:[#allocation4 + $0x200] ss:$8 sps:$4 sm:$0xff]  }
  0x55   :  { %1745 = vmatprep.subr.bf16.mxu0 %v2827_v31  ;;  %1787 = vmatpush1.bf16.msra.mxu1 %v2826_v32  ;;  %v2907_v31 = vld [vmem:[#allocation4 + $0x224] ss:$8 sps:$4 sm:$0xff]   ;;  %v2902_v32 = vld [vmem:[#allocation4 + $0x330] ss:$8 sps:$4 sm:$0xff]   ;;  %v2961_v9 = vld [vmem:[#allocation4 + $0x294] ss:$8 sps:$4 sm:$0xff]  }
  0x56   :  { %1788 = vmatprep.subr.bf16.mxu1 %v2830_v33  ;;  %v2910_v33 = vld [vmem:[#allocation4 + $0x324] ss:$8 sps:$4 sm:$0xff]   ;;  %v98_v47 = vld [vmem:[#allocation2 + $0xc0] sm:$0xff]  ;;  %v2956_v10 = vld [vmem:[#allocation4 + $0x3a0] ss:$8 sps:$4 sm:$0xff]  }
  0x57   :  { %v2923_v52 = vld [vmem:[#allocation4 + $0x2f0] ss:$8 sps:$4 sm:$0xff]   ;;  %v2931_v53 = vld [vmem:[#allocation4 + $0x2e4] ss:$8 sps:$4 sm:$0xff]  }
  0x58   :  { %1746 = vmatpush2.bf16.msra.mxu0 %v2829_v34  ;;  %v2905_v34 = vld [vmem:[#allocation4 + $0x220] ss:$8 sps:$4 sm:$0xff]   ;;  %v2934_v55 = vld [vmem:[#allocation4 + $0x3e4] ss:$8 sps:$4 sm:$0xff]  }
  0x59   :  { %1747 = vmatprep.subr.bf16.mxu0 %v2833_v35  ;;  %1789 = vmatpush2.bf16.msra.mxu1 %v2832_v36  ;;  %v2913_v35 = vld [vmem:[#allocation4 + $0x214] ss:$8 sps:$4 sm:$0xff]   ;;  %v2908_v36 = vld [vmem:[#allocation4 + $0x320] ss:$8 sps:$4 sm:$0xff]   ;;  %v2955_v5 = vld [vmem:[#allocation4 + $0x2a4] ss:$8 sps:$4 sm:$0xff]  }
  0x5a   :  { %1790 = vmatprep.subr.bf16.mxu1 %v2836_v37  ;;  %v2916_v37 = vld [vmem:[#allocation4 + $0x314] ss:$8 sps:$4 sm:$0xff]   ;;  %v2958_v7 = vld [vmem:[#allocation4 + $0x3a4] ss:$8 sps:$4 sm:$0xff]  }
  0x5c   :  { %1748 = vmatpush2.bf16.msra.mxu0 %v2835_v38  ;;  %v2911_v38 = vld [vmem:[#allocation4 + $0x210] ss:$8 sps:$4 sm:$0xff]  }
  0x5d   :  { %1749 = vmatprep.subr.bf16.mxu0 %v2839_v39  ;;  %1791 = vmatpush2.bf16.msra.mxu1 %v2838_v40  ;;  %v2919_v39 = vld [vmem:[#allocation4 + $0x204] ss:$8 sps:$4 sm:$0xff]   ;;  %v79_v40 = vld [vmem:[#allocation2 + $0x28] sm:$0xff] }
  0x5e   :  { %1792 = vmatprep.subr.bf16.mxu1 %v2842_v41  ;;  %v96_v41 = vld [vmem:[#allocation2 + $0xb0] sm:$0xff] }
  0x60   :  { %1750 = vmatpush2.bf16.msra.mxu0 %v2841_v42  ;;  %v2914_v42 = vld [vmem:[#allocation4 + $0x310] ss:$8 sps:$4 sm:$0xff]  }
  0x61   :  { %1751 = vmatprep.subr.bf16.mxu0 %v2845_v43  ;;  %1793 = vmatpush2.bf16.msra.mxu1 %v2844_v44  ;;  %v113_v43 = vpack.c.bf16 %v96_v41, %v79_v40  ;;  %v2922_v44 = vld [vmem:[#allocation4 + $0x304] ss:$8 sps:$4 sm:$0xff]   ;;  %v102_v40 = vld [vmem:[#allocation2 + $0xe0] sm:$0xff] }
  0x62   :  { %1794 = vmatprep.subr.bf16.mxu1 %v2848_v45  ;;  %v81_v45 = vld [vmem:[#allocation2 + $0x38] sm:$0xff]  ;;  %v2986_v41 = vld [vmem:[#allocation4 + $0x550] ss:$8 sps:$4 sm:$0xff]  }
  0x63   :  { %v115_v49 = vpack.c.bf16 %v98_v47, %v81_v45  ;;  %v2997_v45 = vld [vmem:[#allocation4 + $0x434] ss:$8 sps:$4 sm:$0xff]  }
  0x64   :  { %1752 = vmatpush2.bf16.msra.mxu0 %v2847_v48  ;;  %v2925_v48 = vld [vmem:[#allocation4 + $0x2f4] ss:$8 sps:$4 sm:$0xff]  }
  0x65   :  { %1753 = vmatprep.subr.bf16.mxu0 %v2851_v50  ;;  %1795 = vmatpush2.bf16.msra.mxu1 %v2850_v51  ;;  %v2920_v50 = vld [vmem:[#allocation4 + $0x300] ss:$8 sps:$4 sm:$0xff]   ;;  %v2928_v51 = vld [vmem:[#allocation4 + $0x3f4] ss:$8 sps:$4 sm:$0xff]  }
  0x66   :  { %1796 = vmatprep.subr.bf16.mxu1 %v2854_v54  ;;  %v2926_v54 = vld [vmem:[#allocation4 + $0x3f0] ss:$8 sps:$4 sm:$0xff]   ;;  %v3000_v47 = vld [vmem:[#allocation4 + $0x534] ss:$8 sps:$4 sm:$0xff]  }
  0x68   :  { %1754 = vmatpush2.bf16.msra.mxu0 %v2853_v56  ;;  %v2929_v56 = vld [vmem:[#allocation4 + $0x2e0] ss:$8 sps:$4 sm:$0xff]  }
  0x69   :  { %1755 = vmatprep.subr.bf16.mxu0 %v2857_v57  ;;  %1797 = vmatpush2.bf16.msra.mxu1 %v2856_v58  ;;  %v2937_v57 = vld [vmem:[#allocation4 + $0x2d4] ss:$8 sps:$4 sm:$0xff]   ;;  %v2932_v58 = vld [vmem:[#allocation4 + $0x3e0] ss:$8 sps:$4 sm:$0xff]  }
  0x6a   :  { %1798 = vmatprep.subr.bf16.mxu1 %v2860_v59  ;;  %v2940_v59 = vld [vmem:[#allocation4 + $0x3d4] ss:$8 sps:$4 sm:$0xff]  }
  0x6c   :  { %1756 = vmatpush2.bf16.msra.mxu0 %v2859_v60  ;;  %v2935_v60 = vld [vmem:[#allocation4 + $0x2d0] ss:$8 sps:$4 sm:$0xff]  }
  0x6d   :  { %1757 = vmatprep.subr.bf16.mxu0 %v2863_v61  ;;  %1799 = vmatpush2.bf16.msra.mxu1 %v2862_v62  ;;  %v2943_v61 = vld [vmem:[#allocation4 + $0x2c4] ss:$8 sps:$4 sm:$0xff]   ;;  %v2938_v62 = vld [vmem:[#allocation4 + $0x3d0] ss:$8 sps:$4 sm:$0xff]  }
  0x6e   :  { %1800 = vmatprep.subr.bf16.mxu1 %v2866_v63  ;;  %v2946_v63 = vld [vmem:[#allocation4 + $0x3c4] ss:$8 sps:$4 sm:$0xff]  }
  0x70   :  { %1758 = vmatpush2.bf16.msra.mxu0 %v2865_v0  ;;  %v2941_v0 = vld [vmem:[#allocation4 + $0x2c0] ss:$8 sps:$4 sm:$0xff]  }
  0x71   :  { %1759 = vmatprep.subr.bf16.mxu0 %v2869_v2  ;;  %1801 = vmatpush2.bf16.msra.mxu1 %v2868_v1  ;;  %v2949_v1 = vld [vmem:[#allocation4 + $0x2b4] ss:$8 sps:$4 sm:$0xff]   ;;  %v2944_v2 = vld [vmem:[#allocation4 + $0x3c0] ss:$8 sps:$4 sm:$0xff]  }
  0x72   :  { %1802 = vmatprep.subr.bf16.mxu1 %v2872_v4  ;;  %v2947_v4 = vld [vmem:[#allocation4 + $0x2b0] ss:$8 sps:$4 sm:$0xff]  }
  0x74   :  { %1760 = vmatpush2.bf16.msra.mxu0 %v2871_v3  ;;  %v2952_v3 = vld [vmem:[#allocation4 + $0x3b4] ss:$8 sps:$4 sm:$0xff]  }
  0x75   :  { %1815 = vmatprep.subr.bf16.mxu0 %v2877_v8  ;;  %1803 = vmatpush2.bf16.msra.mxu1 %v2874_v6  ;;  %v2950_v6 = vld [vmem:[#allocation4 + $0x3b0] ss:$8 sps:$4 sm:$0xff]   ;;  %v2953_v8 = vld [vmem:[#allocation4 + $0x2a0] ss:$8 sps:$4 sm:$0xff]  }
  0x76   :  { %1858 = vmatprep.subr.bf16.mxu1 %v2880_v12  ;;  %v2959_v12 = vld [vmem:[#allocation4 + $0x290] ss:$8 sps:$4 sm:$0xff]  }
  0x77   :  { %1762 = vmatmul.mubr.bf16.vlgmr.msra.gmra.mxu0 %v108_v11  ;;  %v2964_v11 = vld [vmem:[#allocation4 + $0x394] ss:$8 sps:$4 sm:$0xff]  }
  0x78   :  { %1816 = vmatpush1.bf16.msra.mxu0 %v2875_v13  ;;  %1805 = vmatmul.mubr.bf16.vlgmr.msra.gmra.mxu1 %v110_v14  ;;  %v2962_v13 = vld [vmem:[#allocation4 + $0x390] ss:$8 sps:$4 sm:$0xff]   ;;  %v2967_v14 = vld [vmem:[#allocation4 + $0x284] ss:$8 sps:$4 sm:$0xff]  }
  0x79   :  { %1817 = vmatprep.subr.bf16.mxu0 %v2883_v15  ;;  %1859 = vmatpush1.bf16.msra.mxu1 %v2878_v16  ;;  %v2965_v15 = vld [vmem:[#allocation4 + $0x280] ss:$8 sps:$4 sm:$0xff]   ;;  %v2970_v16 = vld [vmem:[#allocation4 + $0x384] ss:$8 sps:$4 sm:$0xff]  }
  0x7a   :  { %1860 = vmatprep.subr.bf16.mxu1 %v2886_v17  ;;  %1847 = vmatprep.mubr.bf16.mxu0 %v113_v43  ;;  %v78_v17 = vld [vmem:[#allocation2 + $0x20] sm:$0xff]  ;;  %v2994_v43 = vld [vmem:[#allocation4 + $0x544] ss:$8 sps:$4 sm:$0xff]  }
  0x7b   :  { %1890 = vmatprep.mubr.bf16.mxu1 %v115_v49  ;;  %v3003_v49 = vld [vmem:[#allocation4 + $0x424] ss:$8 sps:$4 sm:$0xff]  }
  0x7c   :  { %1818 = vmatpush1.bf16.msra.mxu0 %v2881_v18  ;;  %v2968_v18 = vld [vmem:[#allocation4 + $0x380] ss:$8 sps:$4 sm:$0xff]  }
  0x7d   :  { %1819 = vmatprep.subr.bf16.mxu0 %v2889_v19  ;;  %1861 = vmatpush1.bf16.msra.mxu1 %v2884_v20  ;;  %v95_v19 = vld [vmem:[#allocation2 + $0xa8] sm:$0xff] }
  0x7e   :  { %1862 = vmatprep.subr.bf16.mxu1 %v2892_v21  ;;  %v2973_v20 = vld [vmem:[#allocation4 + $0x474] ss:$8 sps:$4 sm:$0xff]   ;;  %v80_v21 = vld [vmem:[#allocation2 + $0x30] sm:$0xff] }
  0x80   :  { %1820 = vmatpush1.bf16.msra.mxu0 %v2887_v22  ;;  %v97_v22 = vld [vmem:[#allocation2 + $0xb8] sm:$0xff] }
  0x81   :  { %1821 = vmatprep.subr.bf16.mxu0 %v2895_v23  ;;  %1863 = vmatpush1.bf16.msra.mxu1 %v2890_v24  ;;  %v112_v23 = vpack.c.bf16 %v95_v19, %v78_v17  ;;  %v2976_v24 = vld [vmem:[#allocation4 + $0x574] ss:$8 sps:$4 sm:$0xff]   ;;  %v3051_v17 = vld [vmem:[#allocation4 + $0x4a4] ss:$8 sps:$4 sm:$0xff]  }
  0x82   :  { %1864 = vmatprep.subr.bf16.mxu1 %v2898_v25  ;;  %v2971_v25 = vld [vmem:[#allocation4 + $0x470] ss:$8 sps:$4 sm:$0xff]   ;;  %v3054_v19 = vld [vmem:[#allocation4 + $0x5a4] ss:$8 sps:$4 sm:$0xff]  }
  0x84   :  { %1822 = vmatpush1.bf16.msra.mxu0 %v2893_v26  ;;  %v114_v26 = vpack.c.bf16 %v97_v22, %v80_v21  ;;  %v3057_v21 = vld [vmem:[#allocation4 + $0x494] ss:$8 sps:$4 sm:$0xff]   ;;  %v3052_v22 = vld [vmem:[#allocation4 + $0x5a0] ss:$8 sps:$4 sm:$0xff]  }
  0x85   :  { %1823 = vmatprep.subr.bf16.mxu0 %v2901_v27  ;;  %1865 = vmatpush1.bf16.msra.mxu1 %v2896_v28  ;;  %v2979_v27 = vld [vmem:[#allocation4 + $0x464] ss:$8 sps:$4 sm:$0xff]   ;;  %v2974_v28 = vld [vmem:[#allocation4 + $0x570] ss:$8 sps:$4 sm:$0xff]  }
  0x86   :  { %1866 = vmatprep.subr.bf16.mxu1 %v2904_v29  ;;  %v2982_v29 = vld [vmem:[#allocation4 + $0x564] ss:$8 sps:$4 sm:$0xff]  }
  0x88   :  { %1824 = vmatpush1.bf16.msra.mxu0 %v2899_v30  ;;  %v2977_v30 = vld [vmem:[#allocation4 + $0x460] ss:$8 sps:$4 sm:$0xff]  }
  0x89   :  { %1825 = vmatprep.subr.bf16.mxu0 %v2907_v31  ;;  %1867 = vmatpush1.bf16.msra.mxu1 %v2902_v32  ;;  %v2985_v31 = vld [vmem:[#allocation4 + $0x454] ss:$8 sps:$4 sm:$0xff]   ;;  %v2980_v32 = vld [vmem:[#allocation4 + $0x560] ss:$8 sps:$4 sm:$0xff]  }
  0x8a   :  { %1868 = vmatprep.subr.bf16.mxu1 %v2910_v33  ;;  %v83_v33 = vld [vmem:[#allocation2 + $0x48] sm:$0xff] }
  0x8c   :  { %1826 = vmatpush1.bf16.msra.mxu0 %v2905_v34  ;;  %v100_v34 = vld [vmem:[#allocation2 + $0xd0] sm:$0xff] }
  0x8d   :  { %1827 = vmatprep.subr.bf16.mxu0 %v2913_v35  ;;  %1869 = vmatpush1.bf16.msra.mxu1 %v2908_v36  ;;  %v2988_v35 = vld [vmem:[#allocation4 + $0x554] ss:$8 sps:$4 sm:$0xff]   ;;  %v117_v36 = vpack.c.bf16 %v100_v34, %v83_v33  ;;  %v104_v33 = vld [vmem:[#allocation2 + $0xf0] sm:$0xff] }
  0x8e   :  { %1870 = vmatprep.subr.bf16.mxu1 %v2916_v37  ;;  %v2983_v37 = vld [vmem:[#allocation4 + $0x450] ss:$8 sps:$4 sm:$0xff]   ;;  %v3064_v34 = vld [vmem:[#allocation4 + $0x580] ss:$8 sps:$4 sm:$0xff]  }
  0x90   :  { %1828 = vmatpush1.bf16.msra.mxu0 %v2911_v38  ;;  %v2991_v38 = vld [vmem:[#allocation4 + $0x444] ss:$8 sps:$4 sm:$0xff]  }
  0x91   :  { %1829 = vmatprep.subr.bf16.mxu0 %v2919_v39  ;;  %1871 = vmatpush1.bf16.msra.mxu1 %v2914_v42  ;;  %v85_v39 = vld [vmem:[#allocation2 + $0x58] sm:$0xff] }
  0x92   :  { %1872 = vmatprep.subr.bf16.mxu1 %v2922_v44  ;;  %v119_v42 = vpack.c.bf16 %v102_v40, %v85_v39  ;;  %v2989_v44 = vld [vmem:[#allocation4 + $0x440] ss:$8 sps:$4 sm:$0xff]   ;;  %v106_v39 = vld [vmem:[#allocation2 + $0x100] sm:$0xff] }
  0x93   :  { %v3067_v40 = vld [vmem:[#allocation4 + $0x670] ss:$8 sps:$4 sm:$0xff]  }
  0x94   :  { %1830 = vmatpush1.bf16.msra.mxu0 %v2917_v46  ;;  %v2992_v46 = vld [vmem:[#allocation4 + $0x540] ss:$8 sps:$4 sm:$0xff]  }
  0x95   :  { %1831 = vmatprep.subr.bf16.mxu0 %v2925_v48  ;;  %1873 = vmatpush1.bf16.msra.mxu1 %v2920_v50  ;;  %v2995_v48 = vld [vmem:[#allocation4 + $0x430] ss:$8 sps:$4 sm:$0xff]  }
  0x96   :  { %1874 = vmatprep.subr.bf16.mxu1 %v2928_v51  ;;  %v2998_v50 = vld [vmem:[#allocation4 + $0x530] ss:$8 sps:$4 sm:$0xff]   ;;  %v3006_v51 = vld [vmem:[#allocation4 + $0x524] ss:$8 sps:$4 sm:$0xff]  }
  0x98   :  { %1832 = vmatpush2.bf16.msra.mxu0 %v2923_v52  ;;  %v3001_v52 = vld [vmem:[#allocation4 + $0x420] ss:$8 sps:$4 sm:$0xff]  }
  0x99   :  { %1833 = vmatprep.subr.bf16.mxu0 %v2931_v53  ;;  %1875 = vmatpush2.bf16.msra.mxu1 %v2926_v54  ;;  %v3009_v53 = vld [vmem:[#allocation4 + $0x414] ss:$8 sps:$4 sm:$0xff]   ;;  %v3004_v54 = vld [vmem:[#allocation4 + $0x520] ss:$8 sps:$4 sm:$0xff]  }
  0x9a   :  { %1876 = vmatprep.subr.bf16.mxu1 %v2934_v55  ;;  %v3012_v55 = vld [vmem:[#allocation4 + $0x514] ss:$8 sps:$4 sm:$0xff]  }
  0x9c   :  { %1834 = vmatpush2.bf16.msra.mxu0 %v2929_v56  ;;  %v3007_v56 = vld [vmem:[#allocation4 + $0x410] ss:$8 sps:$4 sm:$0xff]  }
  0x9d   :  { %1835 = vmatprep.subr.bf16.mxu0 %v2937_v57  ;;  %1877 = vmatpush2.bf16.msra.mxu1 %v2932_v58  ;;  %v3015_v57 = vld [vmem:[#allocation4 + $0x404] ss:$8 sps:$4 sm:$0xff]   ;;  %v3010_v58 = vld [vmem:[#allocation4 + $0x510] ss:$8 sps:$4 sm:$0xff]  }
  0x9e   :  { %1878 = vmatprep.subr.bf16.mxu1 %v2940_v59  ;;  %v3018_v59 = vld [vmem:[#allocation4 + $0x504] ss:$8 sps:$4 sm:$0xff]  }
  0xa0   :  { %1836 = vmatpush2.bf16.msra.mxu0 %v2935_v60  ;;  %v3013_v60 = vld [vmem:[#allocation4 + $0x400] ss:$8 sps:$4 sm:$0xff]  }
  0xa1   :  { %1837 = vmatprep.subr.bf16.mxu0 %v2943_v61  ;;  %1879 = vmatpush2.bf16.msra.mxu1 %v2938_v62  ;;  %v3021_v61 = vld [vmem:[#allocation4 + $0x4f4] ss:$8 sps:$4 sm:$0xff]   ;;  %v3016_v62 = vld [vmem:[#allocation4 + $0x500] ss:$8 sps:$4 sm:$0xff]  }
  0xa2   :  { %1880 = vmatprep.subr.bf16.mxu1 %v2946_v63  ;;  %v3024_v63 = vld [vmem:[#allocation4 + $0x5f4] ss:$8 sps:$4 sm:$0xff]  }
  0xa4   :  { %1838 = vmatpush2.bf16.msra.mxu0 %v2941_v0  ;;  %v3019_v0 = vld [vmem:[#allocation4 + $0x4f0] ss:$8 sps:$4 sm:$0xff]  }
  0xa5   :  { %1839 = vmatprep.subr.bf16.mxu0 %v2949_v1  ;;  %1881 = vmatpush2.bf16.msra.mxu1 %v2944_v2  ;;  %v3027_v1 = vld [vmem:[#allocation4 + $0x4e4] ss:$8 sps:$4 sm:$0xff]   ;;  %v3022_v2 = vld [vmem:[#allocation4 + $0x5f0] ss:$8 sps:$4 sm:$0xff]  }
  0xa6   :  { %1882 = vmatprep.subr.bf16.mxu1 %v2952_v3  ;;  %v3030_v3 = vld [vmem:[#allocation4 + $0x5e4] ss:$8 sps:$4 sm:$0xff]  }
  0xa8   :  { %1840 = vmatpush2.bf16.msra.mxu0 %v2947_v4  ;;  %v3025_v4 = vld [vmem:[#allocation4 + $0x4e0] ss:$8 sps:$4 sm:$0xff]  }
  0xa9   :  { %1841 = vmatprep.subr.bf16.mxu0 %v2955_v5  ;;  %1883 = vmatpush2.bf16.msra.mxu1 %v2950_v6  ;;  %v3033_v5 = vld [vmem:[#allocation4 + $0x4d4] ss:$8 sps:$4 sm:$0xff]   ;;  %v3028_v6 = vld [vmem:[#allocation4 + $0x5e0] ss:$8 sps:$4 sm:$0xff]  }
  0xaa   :  { %1884 = vmatprep.subr.bf16.mxu1 %v2958_v7  ;;  %v3036_v7 = vld [vmem:[#allocation4 + $0x5d4] ss:$8 sps:$4 sm:$0xff]  }
  0xac   :  { %1842 = vmatpush2.bf16.msra.mxu0 %v2953_v8  ;;  %v3031_v8 = vld [vmem:[#allocation4 + $0x4d0] ss:$8 sps:$4 sm:$0xff]  }
  0xad   :  { %1843 = vmatprep.subr.bf16.mxu0 %v2961_v9  ;;  %1885 = vmatpush2.bf16.msra.mxu1 %v2956_v10  ;;  %v3039_v9 = vld [vmem:[#allocation4 + $0x4c4] ss:$8 sps:$4 sm:$0xff]   ;;  %v3034_v10 = vld [vmem:[#allocation4 + $0x5d0] ss:$8 sps:$4 sm:$0xff]  }
  0xae   :  { %1886 = vmatprep.subr.bf16.mxu1 %v2964_v11  ;;  %v3042_v11 = vld [vmem:[#allocation4 + $0x5c4] ss:$8 sps:$4 sm:$0xff]  }
  0xb0   :  { %1844 = vmatpush2.bf16.msra.mxu0 %v2959_v12  ;;  %v3037_v12 = vld [vmem:[#allocation4 + $0x4c0] ss:$8 sps:$4 sm:$0xff]  }
  0xb1   :  { %1845 = vmatprep.subr.bf16.mxu0 %v2967_v14  ;;  %1887 = vmatpush2.bf16.msra.mxu1 %v2962_v13  ;;  %v3045_v13 = vld [vmem:[#allocation4 + $0x4b4] ss:$8 sps:$4 sm:$0xff]   ;;  %v3040_v14 = vld [vmem:[#allocation4 + $0x5c0] ss:$8 sps:$4 sm:$0xff]  }
  0xb2   :  { %1888 = vmatprep.subr.bf16.mxu1 %v2970_v16  ;;  %v3043_v16 = vld [vmem:[#allocation4 + $0x4b0] ss:$8 sps:$4 sm:$0xff]  }
  0xb4   :  { %1846 = vmatpush2.bf16.msra.mxu0 %v2965_v15  ;;  %v3048_v15 = vld [vmem:[#allocation4 + $0x5b4] ss:$8 sps:$4 sm:$0xff]  }
  0xb5   :  { %1901 = vmatprep.subr.bf16.mxu0 %v2973_v20  ;;  %1889 = vmatpush2.bf16.msra.mxu1 %v2968_v18  ;;  %v3046_v18 = vld [vmem:[#allocation4 + $0x5b0] ss:$8 sps:$4 sm:$0xff]   ;;  %v3049_v20 = vld [vmem:[#allocation4 + $0x4a0] ss:$8 sps:$4 sm:$0xff]  }
  0xb6   :  { %1944 = vmatprep.subr.bf16.mxu1 %v2976_v24  ;;  %v3060_v24 = vld [vmem:[#allocation4 + $0x594] ss:$8 sps:$4 sm:$0xff]  }
  0xb7   :  { %1848 = vmatmul.mubr.bf16.vlgmr.msra.gmra.mxu0 %v112_v23  ;;  %v3055_v23 = vld [vmem:[#allocation4 + $0x490] ss:$8 sps:$4 sm:$0xff]  }
  0xb8   :  { %1902 = vmatpush1.bf16.msra.mxu0 %v2971_v25  ;;  %1891 = vmatmul.mubr.bf16.vlgmr.msra.gmra.mxu1 %v114_v26  ;;  %v3058_v25 = vld [vmem:[#allocation4 + $0x590] ss:$8 sps:$4 sm:$0xff]   ;;  %v3063_v26 = vld [vmem:[#allocation4 + $0x484] ss:$8 sps:$4 sm:$0xff]  }
  0xb9   :  { %1903 = vmatprep.subr.bf16.mxu0 %v2979_v27  ;;  %1945 = vmatpush1.bf16.msra.mxu1 %v2974_v28  ;;  %v3066_v27 = vld [vmem:[#allocation4 + $0x584] ss:$8 sps:$4 sm:$0xff]   ;;  %v3061_v28 = vld [vmem:[#allocation4 + $0x480] ss:$8 sps:$4 sm:$0xff]  }
  0xba   :  { %1946 = vmatprep.subr.bf16.mxu1 %v2982_v29  ;;  %1933 = vmatprep.mubr.bf16.mxu0 %v117_v36  ;;  %v82_v29 = vld [vmem:[#allocation2 + $0x40] sm:$0xff]  ;;  %v101_v36 = vld [vmem:[#allocation2 + $0xd8] sm:$0xff] }
  0xbb   :  { %1976 = vmatprep.mubr.bf16.mxu1 %v119_v42  ;;  %v3075_v42 = vld [vmem:[#allocation4 + $0x664] ss:$8 sps:$4 sm:$0xff]  }
  0xbc   :  { %1904 = vmatpush1.bf16.msra.mxu0 %v2977_v30  ;;  %v99_v30 = vld [vmem:[#allocation2 + $0xc8] sm:$0xff] }
  0xbd   :  { %1905 = vmatprep.subr.bf16.mxu0 %v2985_v31  ;;  %1947 = vmatpush1.bf16.msra.mxu1 %v2980_v32  ;;  %v3069_v31 = vld [vmem:[#allocation4 + $0x674] ss:$8 sps:$4 sm:$0xff]  }
  0xbe   :  { %1948 = vmatprep.subr.bf16.mxu1 %v2988_v35  ;;  %v87_v32 = vld [vmem:[#allocation2 + $0x68] sm:$0xff]  ;;  %v84_v35 = vld [vmem:[#allocation2 + $0x50] sm:$0xff] }
  0xc0   :  { %1906 = vmatpush1.bf16.msra.mxu0 %v2983_v37  ;;  %v3072_v37 = vld [vmem:[#allocation4 + $0x774] ss:$8 sps:$4 sm:$0xff]  }
  0xc1   :  { %1907 = vmatprep.subr.bf16.mxu0 %v2991_v38  ;;  %1949 = vmatpush1.bf16.msra.mxu1 %v2986_v41  ;;  %v89_v38 = vld [vmem:[#allocation2 + $0x78] sm:$0xff]  ;;  %v116_v41 = vpack.c.bf16 %v99_v30, %v82_v29  ;;  %v3142_v30 = vld [vmem:[#allocation4 + $0x7b0] ss:$8 sps:$4 sm:$0xff]  }
  0xc2   :  { %1950 = vmatprep.subr.bf16.mxu1 %v2994_v43  ;;  %v3070_v43 = vld [vmem:[#allocation4 + $0x770] ss:$8 sps:$4 sm:$0xff]   ;;  %v3147_v29 = vld [vmem:[#allocation4 + $0x6a4] ss:$8 sps:$4 sm:$0xff]  }
  0xc4   :  { %1908 = vmatpush1.bf16.msra.mxu0 %v2989_v44  ;;  %v121_v44 = vpack.c.bf16 %v104_v33, %v87_v32  ;;  %v3145_v32 = vld [vmem:[#allocation4 + $0x6a0] ss:$8 sps:$4 sm:$0xff]   ;;  %v3153_v33 = vld [vmem:[#allocation4 + $0x694] ss:$8 sps:$4 sm:$0xff]  }
  0xc5   :  { %1909 = vmatprep.subr.bf16.mxu0 %v2997_v45  ;;  %1951 = vmatpush1.bf16.msra.mxu1 %v2992_v46  ;;  %v118_v45 = vpack.c.bf16 %v101_v36, %v84_v35  ;;  %v3078_v46 = vld [vmem:[#allocation4 + $0x764] ss:$8 sps:$4 sm:$0xff]   ;;  %v387_v35 = vld [vmem:[#allocation4 + $0x830] sm:$0xff] }
  0xc6   :  { %1952 = vmatprep.subr.bf16.mxu1 %v3000_v47  ;;  %v3073_v47 = vld [vmem:[#allocation4 + $0x660] ss:$8 sps:$4 sm:$0xff]   ;;  %v3156_v36 = vld [vmem:[#allocation4 + $0x794] ss:$8 sps:$4 sm:$0xff]  }
  0xc8   :  { %1910 = vmatpush1.bf16.msra.mxu0 %v2995_v48  ;;  %v123_v48 = vpack.c.bf16 %v106_v39, %v89_v38  ;;  %v3151_v39 = vld [vmem:[#allocation4 + $0x690] ss:$8 sps:$4 sm:$0xff]  }
  0xc9   :  { %1911 = vmatprep.subr.bf16.mxu0 %v3003_v49  ;;  %1953 = vmatpush1.bf16.msra.mxu1 %v2998_v50  ;;  %v3081_v49 = vld [vmem:[#allocation4 + $0x654] ss:$8 sps:$4 sm:$0xff]   ;;  %v3076_v50 = vld [vmem:[#allocation4 + $0x760] ss:$8 sps:$4 sm:$0xff]  }
  0xca   :  { %1954 = vmatprep.subr.bf16.mxu1 %v3006_v51  ;;  %v3084_v51 = vld [vmem:[#allocation4 + $0x754] ss:$8 sps:$4 sm:$0xff]  }
  0xcc   :  { %1912 = vmatpush1.bf16.msra.mxu0 %v3001_v52  ;;  %v3079_v52 = vld [vmem:[#allocation4 + $0x650] ss:$8 sps:$4 sm:$0xff]  }
  0xcd   :  { %1913 = vmatprep.subr.bf16.mxu0 %v3009_v53  ;;  %1955 = vmatpush1.bf16.msra.mxu1 %v3004_v54  ;;  %v3087_v53 = vld [vmem:[#allocation4 + $0x644] ss:$8 sps:$4 sm:$0xff]   ;;  %v3082_v54 = vld [vmem:[#allocation4 + $0x750] ss:$8 sps:$4 sm:$0xff]  }
  0xce   :  { %1956 = vmatprep.subr.bf16.mxu1 %v3012_v55  ;;  %v3090_v55 = vld [vmem:[#allocation4 + $0x744] ss:$8 sps:$4 sm:$0xff]  }
  0xd0   :  { %1914 = vmatpush1.bf16.msra.mxu0 %v3007_v56  ;;  %v3085_v56 = vld [vmem:[#allocation4 + $0x640] ss:$8 sps:$4 sm:$0xff]  }
  0xd1   :  { %1915 = vmatprep.subr.bf16.mxu0 %v3015_v57  ;;  %1957 = vmatpush1.bf16.msra.mxu1 %v3010_v58  ;;  %v3093_v57 = vld [vmem:[#allocation4 + $0x634] ss:$8 sps:$4 sm:$0xff]   ;;  %v3088_v58 = vld [vmem:[#allocation4 + $0x740] ss:$8 sps:$4 sm:$0xff]  }
  0xd2   :  { %1958 = vmatprep.subr.bf16.mxu1 %v3018_v59  ;;  %v3096_v59 = vld [vmem:[#allocation4 + $0x734] ss:$8 sps:$4 sm:$0xff]  }
  0xd4   :  { %1916 = vmatpush1.bf16.msra.mxu0 %v3013_v60  ;;  %v3091_v60 = vld [vmem:[#allocation4 + $0x630] ss:$8 sps:$4 sm:$0xff]  }
  0xd5   :  { %1917 = vmatprep.subr.bf16.mxu0 %v3021_v61  ;;  %1959 = vmatpush1.bf16.msra.mxu1 %v3016_v62  ;;  %v3099_v61 = vld [vmem:[#allocation4 + $0x624] ss:$8 sps:$4 sm:$0xff]   ;;  %v3094_v62 = vld [vmem:[#allocation4 + $0x730] ss:$8 sps:$4 sm:$0xff]  }
  0xd6   :  { %1960 = vmatprep.subr.bf16.mxu1 %v3024_v63  ;;  %v3102_v63 = vld [vmem:[#allocation4 + $0x724] ss:$8 sps:$4 sm:$0xff]  }
  0xd8   :  { %1918 = vmatpush2.bf16.msra.mxu0 %v3019_v0  ;;  %v3097_v0 = vld [vmem:[#allocation4 + $0x620] ss:$8 sps:$4 sm:$0xff]  }
  0xd9   :  { %1919 = vmatprep.subr.bf16.mxu0 %v3027_v1  ;;  %1961 = vmatpush2.bf16.msra.mxu1 %v3022_v2  ;;  %v3105_v1 = vld [vmem:[#allocation4 + $0x614] ss:$8 sps:$4 sm:$0xff]   ;;  %v3100_v2 = vld [vmem:[#allocation4 + $0x720] ss:$8 sps:$4 sm:$0xff]  }
  0xda   :  { %1962 = vmatprep.subr.bf16.mxu1 %v3030_v3  ;;  %v3108_v3 = vld [vmem:[#allocation4 + $0x714] ss:$8 sps:$4 sm:$0xff]  }
  0xdc   :  { %1920 = vmatpush2.bf16.msra.mxu0 %v3025_v4  ;;  %v3103_v4 = vld [vmem:[#allocation4 + $0x610] ss:$8 sps:$4 sm:$0xff]  }
  0xdd   :  { %1921 = vmatprep.subr.bf16.mxu0 %v3033_v5  ;;  %1963 = vmatpush2.bf16.msra.mxu1 %v3028_v6  ;;  %v3111_v5 = vld [vmem:[#allocation4 + $0x604] ss:$8 sps:$4 sm:$0xff]   ;;  %v3106_v6 = vld [vmem:[#allocation4 + $0x710] ss:$8 sps:$4 sm:$0xff]  }
  0xde   :  { %1964 = vmatprep.subr.bf16.mxu1 %v3036_v7  ;;  %v3114_v7 = vld [vmem:[#allocation4 + $0x704] ss:$8 sps:$4 sm:$0xff]  }
  0xe0   :  { %1922 = vmatpush2.bf16.msra.mxu0 %v3031_v8  ;;  %v3109_v8 = vld [vmem:[#allocation4 + $0x600] ss:$8 sps:$4 sm:$0xff]  }
  0xe1   :  { %1923 = vmatprep.subr.bf16.mxu0 %v3039_v9  ;;  %1965 = vmatpush2.bf16.msra.mxu1 %v3034_v10  ;;  %v3117_v9 = vld [vmem:[#allocation4 + $0x6f4] ss:$8 sps:$4 sm:$0xff]   ;;  %v3112_v10 = vld [vmem:[#allocation4 + $0x700] ss:$8 sps:$4 sm:$0xff]  }
  0xe2   :  { %1966 = vmatprep.subr.bf16.mxu1 %v3042_v11  ;;  %v3120_v11 = vld [vmem:[#allocation4 + $0x7f4] ss:$8 sps:$4 sm:$0xff]  }
  0xe4   :  { %1924 = vmatpush2.bf16.msra.mxu0 %v3037_v12  ;;  %v3115_v12 = vld [vmem:[#allocation4 + $0x6f0] ss:$8 sps:$4 sm:$0xff]  }
  0xe5   :  { %1925 = vmatprep.subr.bf16.mxu0 %v3045_v13  ;;  %1967 = vmatpush2.bf16.msra.mxu1 %v3040_v14  ;;  %v3123_v13 = vld [vmem:[#allocation4 + $0x6e4] ss:$8 sps:$4 sm:$0xff]   ;;  %v3118_v14 = vld [vmem:[#allocation4 + $0x7f0] ss:$8 sps:$4 sm:$0xff]  }
  0xe6   :  { %1968 = vmatprep.subr.bf16.mxu1 %v3048_v15  ;;  %v3126_v15 = vld [vmem:[#allocation4 + $0x7e4] ss:$8 sps:$4 sm:$0xff]  }
  0xe8   :  { %1926 = vmatpush2.bf16.msra.mxu0 %v3043_v16  ;;  %v3121_v16 = vld [vmem:[#allocation4 + $0x6e0] ss:$8 sps:$4 sm:$0xff]  }
  0xe9   :  { %1927 = vmatprep.subr.bf16.mxu0 %v3051_v17  ;;  %1969 = vmatpush2.bf16.msra.mxu1 %v3046_v18  ;;  %v3129_v17 = vld [vmem:[#allocation4 + $0x6d4] ss:$8 sps:$4 sm:$0xff]   ;;  %v3124_v18 = vld [vmem:[#allocation4 + $0x7e0] ss:$8 sps:$4 sm:$0xff]  }
  0xea   :  { %1970 = vmatprep.subr.bf16.mxu1 %v3054_v19  ;;  %v3132_v19 = vld [vmem:[#allocation4 + $0x7d4] ss:$8 sps:$4 sm:$0xff]  }
  0xec   :  { %1928 = vmatpush2.bf16.msra.mxu0 %v3049_v20  ;;  %v3127_v20 = vld [vmem:[#allocation4 + $0x6d0] ss:$8 sps:$4 sm:$0xff]  }
  0xed   :  { %1929 = vmatprep.subr.bf16.mxu0 %v3057_v21  ;;  %1971 = vmatpush2.bf16.msra.mxu1 %v3052_v22  ;;  %v3135_v21 = vld [vmem:[#allocation4 + $0x6c4] ss:$8 sps:$4 sm:$0xff]   ;;  %v3130_v22 = vld [vmem:[#allocation4 + $0x7d0] ss:$8 sps:$4 sm:$0xff]  }
  0xee   :  { %1972 = vmatprep.subr.bf16.mxu1 %v3060_v24  ;;  %v3133_v24 = vld [vmem:[#allocation4 + $0x6c0] ss:$8 sps:$4 sm:$0xff]  }
  0xf0   :  { %1930 = vmatpush2.bf16.msra.mxu0 %v3055_v23  ;;  %v3138_v23 = vld [vmem:[#allocation4 + $0x7c4] ss:$8 sps:$4 sm:$0xff]  }
  0xf1   :  { %1931 = vmatprep.subr.bf16.mxu0 %v3063_v26  ;;  %1973 = vmatpush2.bf16.msra.mxu1 %v3058_v25  ;;  %v3141_v25 = vld [vmem:[#allocation4 + $0x6b4] ss:$8 sps:$4 sm:$0xff]   ;;  %v3136_v26 = vld [vmem:[#allocation4 + $0x7c0] ss:$8 sps:$4 sm:$0xff]  }
  0xf2   :  { %1974 = vmatprep.subr.bf16.mxu1 %v3066_v27  ;;  %v3144_v27 = vld [vmem:[#allocation4 + $0x7b4] ss:$8 sps:$4 sm:$0xff]  }
  0xf4   :  { %1932 = vmatpush2.bf16.msra.mxu0 %v3061_v28  ;;  %v3139_v28 = vld [vmem:[#allocation4 + $0x6b0] ss:$8 sps:$4 sm:$0xff]  }
  0xf5   :  { %1987 = vmatprep.subr.bf16.mxu0 %v3069_v31  ;;  %1975 = vmatpush2.bf16.msra.mxu1 %v3064_v34  ;;  %v3150_v31 = vld [vmem:[#allocation4 + $0x7a4] ss:$8 sps:$4 sm:$0xff]   ;;  %v3148_v34 = vld [vmem:[#allocation4 + $0x7a0] ss:$8 sps:$4 sm:$0xff]  }
  0xf6   :  { %2030 = vmatprep.subr.bf16.mxu1 %v3072_v37  ;;  %v3294_v37 = vmov 65535  }
  0xf7   :  { %1934 = vmatmul.mubr.bf16.vlgmr.msra.gmra.mxu0 %v116_v41  ;;  %v1721_v38 = vsel %vm1719_vm0, 4294967295, %v3294_v37  ;;  %v2686_v41 = vcombine.high %v387_v35, %v387_v35 }
  0xf8   :  { %1988 = vmatpush1.bf16.msra.mxu0 %v3067_v40  ;;  %2019 = vmatprep.mubr.bf16.mxu0 %v121_v44  ;;  %v3159_v40 = vld [vmem:[#allocation4 + $0x684] ss:$8 sps:$4 sm:$0xff]  }
  0xf9   :  { %1977 = vmatmul.mubr.bf16.vlgmr.msra.gmra.mxu1 %v118_v45  ;;  %1989 = vmatprep.subr.bf16.mxu0 %v3075_v42  ;;  %v3154_v42 = vld [vmem:[#allocation4 + $0x790] ss:$8 sps:$4 sm:$0xff]   ;;  %v3162_v44 = vld [vmem:[#allocation4 + $0x784] ss:$8 sps:$4 sm:$0xff]   ;;  %v3157_v45 = vld [vmem:[#allocation4 + $0x680] ss:$8 sps:$4 sm:$0xff]  }
  0xfa   :  { %2031 = vmatpush1.bf16.msra.mxu1 %v3070_v43  ;;  %2062 = vmatprep.mubr.bf16.mxu1 %v123_v48  ;;  %v1722_v43 = vsel %vm1720_vm1, %v1721_v38, 0  ;;  %v2685_v48 = vcombine.low %v387_v35, %v387_v35 }
  0xfb   :  { %2032 = vmatprep.subr.bf16.mxu1 %v3078_v46  ;;  %v86_v46 = vld [vmem:[#allocation2 + $0x60] sm:$0xff] }
  0xfc   :  { %1990 = vmatpush1.bf16.msra.mxu0 %v3073_v47  ;;  %v103_v47 = vld [vmem:[#allocation2 + $0xe8] sm:$0xff] }
  0xfd   :  { %1991 = vmatprep.subr.bf16.mxu0 %v3081_v49  ;;  %v1727_v49 = vand.u32 %v2686_v41, %v1722_v43 }
  0xfe   :  { %2033 = vmatpush1.bf16.msra.mxu1 %v3076_v50  ;;  %v3160_v50 = vld [vmem:[#allocation4 + $0x780] ss:$8 sps:$4 sm:$0xff]  }
  0xff   :  { %2034 = vmatprep.subr.bf16.mxu1 %v3084_v51  ;;  %v88_v51 = vld [vmem:[#allocation2 + $0x70] sm:$0xff] }
 0x100   :  { %1992 = vmatpush1.bf16.msra.mxu0 %v3079_v52  ;;  %v105_v52 = vld [vmem:[#allocation2 + $0xf8] sm:$0xff] }
 0x101   :  { %1993 = vmatprep.subr.bf16.mxu0 %v3087_v53  ;;  %v120_v53 = vpack.c.bf16 %v103_v47, %v86_v46 }
 0x102   :  { %2035 = vmatpush1.bf16.msra.mxu1 %v3082_v54  ;;  %v1724_v54 = vand.u32 %v2685_v48, %v1722_v43 }
 0x103   :  { %2036 = vmatprep.subr.bf16.mxu1 %v3090_v55  ;;  %v122_v55 = vpack.c.bf16 %v105_v52, %v88_v51 }
 0x104   :  { %1994 = vmatpush1.bf16.msra.mxu0 %v3085_v56  ;;  %v3167_v56 = vld [vmem:[#allocation4 + $0x824] ss:$8 sps:$4 sm:$0xff]  }
 0x105   :  { %1995 = vmatprep.subr.bf16.mxu0 %v3093_v57  ;;  %v3165_v57 = vld [vmem:[#allocation4 + $0x820] ss:$8 sps:$4 sm:$0xff]  }
 0x106   :  { %2037 = vmatpush1.bf16.msra.mxu1 %v3088_v58  ;;  %v3295_v58 = vmov 0  }
 0x107   :  { %2038 = vmatprep.subr.bf16.mxu1 %v3096_v59  ;;  %v3170_v59 = vld [vmem:[#allocation4 + $0x814] ss:$8 sps:$4 sm:$0xff]  }
 0x108   :  { %1996 = vmatpush1.bf16.msra.mxu0 %v3091_v60  ;;  %v3168_v60 = vld [vmem:[#allocation4 + $0x810] ss:$8 sps:$4 sm:$0xff]  }
 0x109   :  { %1997 = vmatprep.subr.bf16.mxu0 %v3099_v61  ;;  %v3173_v61 = vld [vmem:[#allocation4 + $0x804] ss:$8 sps:$4 sm:$0xff]  }
 0x10a   :  { %2039 = vmatpush1.bf16.msra.mxu1 %v3094_v62  ;;  %v3171_v62 = vld [vmem:[#allocation4 + $0x800] ss:$8 sps:$4 sm:$0xff]  }
 0x10b   :  { %2040 = vmatprep.subr.bf16.mxu1 %v3102_v63  ;;  %v90_v63 = vld [vmem:[#allocation2 + $0x80] sm:$0xff] }
 0x10c   :  { %1998 = vmatpush1.bf16.msra.mxu0 %v3097_v0  ;;  %v107_v0 = vld [vmem:[#allocation2 + $0x108] sm:$0xff] }
 0x10d   :  { %1999 = vmatprep.subr.bf16.mxu0 %v3105_v1  ;;  %v3174_v1 = vld [vmem:[#allocation6 + $0x78] sm:$0xff]  }
 0x10e   :  { %2041 = vmatpush1.bf16.msra.mxu1 %v3100_v2  ;;  %v3175_v2 = vld [vmem:[#allocation6 + $0x38] sm:$0xff]  }
 0x10f   :  { %2042 = vmatprep.subr.bf16.mxu1 %v3108_v3  ;;  %v124_v3 = vpack.c.bf16 %v107_v0, %v90_v63 }
 0x110   :  { %2000 = vmatpush1.bf16.msra.mxu0 %v3103_v4  ;;  %v3176_v4 = vld [vmem:[#allocation6 + $0x70] sm:$0xff]  }
 0x111   :  { %2001 = vmatprep.subr.bf16.mxu0 %v3111_v5  ;;  %v3177_v5 = vld [vmem:[#allocation6 + $0x30] sm:$0xff]  }
 0x112   :  { %2043 = vmatpush1.bf16.msra.mxu1 %v3106_v6  ;;  %v3178_v6 = vld [vmem:[#allocation6 + $0x68] sm:$0xff]  }
 0x113   :  { %2044 = vmatprep.subr.bf16.mxu1 %v3114_v7  ;;  %v3179_v7 = vld [vmem:[#allocation6 + $0x28] sm:$0xff]  }
 0x114   :  { %2002 = vmatpush1.bf16.msra.mxu0 %v3109_v8  ;;  %v3180_v8 = vld [vmem:[#allocation6 + $0x60] sm:$0xff]  }
 0x115   :  { %2003 = vmatprep.subr.bf16.mxu0 %v3117_v9  ;;  %v3181_v9 = vld [vmem:[#allocation6 + $0x20] sm:$0xff]  }
 0x116   :  { %2045 = vmatpush1.bf16.msra.mxu1 %v3112_v10  ;;  %v3182_v10 = vld [vmem:[#allocation6 + $0x58] sm:$0xff]  }
 0x117   :  { %2046 = vmatprep.subr.bf16.mxu1 %v3120_v11  ;;  %v3183_v11 = vld [vmem:[#allocation6 + $0x18] sm:$0xff]  }
 0x118   :  { %2004 = vmatpush2.bf16.msra.mxu0 %v3115_v12  ;;  %v3184_v12 = vld [vmem:[#allocation6 + $0x50] sm:$0xff]  }
 0x119   :  { %2005 = vmatprep.subr.bf16.mxu0 %v3123_v13  ;;  %v3185_v13 = vld [vmem:[#allocation6 + $0x10] sm:$0xff]  }
 0x11a   :  { %2047 = vmatpush2.bf16.msra.mxu1 %v3118_v14  ;;  %v3186_v14 = vld [vmem:[#allocation6 + $0x48] sm:$0xff]  }
 0x11b   :  { %2048 = vmatprep.subr.bf16.mxu1 %v3126_v15  ;;  %v3187_v15 = vld [vmem:[#allocation6 + $0x8] sm:$0xff]  }
 0x11c   :  { %2006 = vmatpush2.bf16.msra.mxu0 %v3121_v16  ;;  %v3188_v16 = vld [vmem:[#allocation6 + $0x40] sm:$0xff]  }
 0x11d   :  { %2007 = vmatprep.subr.bf16.mxu0 %v3129_v17  ;;  %v3189_v17 = vld [vmem:[#allocation6] sm:$0xff]  }
 0x11e   :  { %2049 = vmatpush2.bf16.msra.mxu1 %v3124_v18  ;;  %v3190_v18 = vld [vmem:[%s3382_s3 + $0x38] sm:$0xff]  }
 0x11f   :  { %2050 = vmatprep.subr.bf16.mxu1 %v3132_v19  ;;  %v3296_v19 = vmov 0.0  }
 0x120   :  { %2008 = vmatpush2.bf16.msra.mxu0 %v3127_v20  ;;  %v3191_v20 = vld [vmem:[%s3382_s3 + $0x30] sm:$0xff]  }
 0x121   :  { %2009 = vmatprep.subr.bf16.mxu0 %v3135_v21  ;;  %v3192_v21 = vld [vmem:[%s3382_s3 + $0x28] sm:$0xff]  }
 0x122   :  { %2051 = vmatpush2.bf16.msra.mxu1 %v3130_v22  ;;  %v3193_v22 = vld [vmem:[%s3382_s3 + $0x20] sm:$0xff]  }
 0x123   :  { %2052 = vmatprep.subr.bf16.mxu1 %v3138_v23 }
 0x124   :  { %2010 = vmatpush2.bf16.msra.mxu0 %v3133_v24 }
 0x125   :  { %2011 = vmatprep.subr.bf16.mxu0 %v3141_v25 }
 0x126   :  { %2053 = vmatpush2.bf16.msra.mxu1 %v3136_v26 }
 0x127   :  { %2054 = vmatprep.subr.bf16.mxu1 %v3144_v27 }
 0x128   :  { %2012 = vmatpush2.bf16.msra.mxu0 %v3139_v28 }
 0x129   :  { %2013 = vmatprep.subr.bf16.mxu0 %v3147_v29 }
 0x12a   :  { %2055 = vmatpush2.bf16.msra.mxu1 %v3142_v30 }
 0x12b   :  { %2056 = vmatprep.subr.bf16.mxu1 %v3150_v31 }
 0x12c   :  { %2014 = vmatpush2.bf16.msra.mxu0 %v3145_v32 }
 0x12d   :  { %2015 = vmatprep.subr.bf16.mxu0 %v3153_v33 }
 0x12e   :  { %2057 = vmatpush2.bf16.msra.mxu1 %v3148_v34  ;;  %v390_v34 = vlaneseq }
 0x12f   :  { %2058 = vmatprep.subr.bf16.mxu1 %v3156_v36 }
 0x130   :  { %2016 = vmatpush2.bf16.msra.mxu0 %v3151_v39  ;;  %v391_v37 = vshrl.u32 %v390_v34, 7 }
 0x131   :  { %2017 = vmatprep.subr.bf16.mxu0 %v3159_v40 }
 0x132   :  { %2059 = vmatpush2.bf16.msra.mxu1 %v3154_v42  ;;  %v396_v41 = vsub.s32 1, %v391_v37  ;;  %v388_v42 = vld [vmem:[#allocation7] sm:$0x3]  ;;  %v392_v43 = vsub.s32 0, %v391_v37 }
 0x133   :  { %2060 = vmatprep.subr.bf16.mxu1 %v3162_v44 }
 0x134   :  { %2018 = vmatpush2.bf16.msra.mxu0 %v3157_v45  ;;  %v397_v47 = vrot.slane %v388_v42, %v396_v41  ;;  %v393_v48 = vrot.slane %v388_v42, %v392_v43 }
 0x135   :  { %2081 = vmatprep.subr.bf16.mxu0 %v1727_v49 }
 0x136   :  { %2061 = vmatpush2.bf16.msra.mxu1 %v3160_v50 }
 0x137   :  { %2020 = vmatmul.mubr.bf16.vlgmr.msra.gmra.mxu0 %v120_v53  ;;  %2714 = vmatprep.subr.bf16.mxu1 %v3174_v1  ;;  %v1763_v23 = vpop.f32.mrf.mxu0 }
 0x138   :  { %2082 = vmatpush1.bf16.msra.mxu0 %v1724_v54  ;;  %2105 = vmatprep.mubr.bf16.mxu0 %v3295_v58  ;;  %v1806_v25 = vpop.f32.mrf.mxu1  ;;  %v1764_v53 = vadd.f32 %v1763_v23, %v393_v48 }
 0x139   :  { %2063 = vmatmul.mubr.bf16.vlgmr.msra.gmra.mxu1 %v122_v55  ;;  %2083 = vmatprep.subr.bf16.mxu0 %v3167_v56  ;;  %v1765_v24 = vpop.f32.mrf.mxu0 }
 0x13a   :  { %2715 = vmatpush3.bf16.msra.mxu1 %v3175_v2  ;;  %v1808_v27 = vpop.f32.mrf.mxu1  ;;  %v1766_v51 = vadd.f32 %v1765_v24, %v397_v47 }
 0x13b   :  { %2716 = vmatprep.subr.bf16.mxu1 %v3176_v4  ;;  %v1767_v26 = vpop.f32.mrf.mxu0 }
 0x13c   :  { %2084 = vmatpush1.bf16.msra.mxu0 %v3165_v57  ;;  %v1810_v29 = vpop.f32.mrf.mxu1  ;;  %v1768_v52 = vadd.f32 %v1767_v26, %v393_v48  ;;  %v1809_v57 = vadd.f32 %v1808_v27, %v1766_v51  ;;  %v3197_v48 = vld [vmem:[%s3382_s3] sm:$0xff]  }
 0x13d   :  { %2085 = vmatprep.subr.bf16.mxu0 %v3170_v59  ;;  %v1769_v28 = vpop.f32.mrf.mxu0  ;;  %v1807_v59 = vadd.f32 %v1806_v25, %v1764_v53 }
 0x13e   :  { %2717 = vmatpush3.bf16.msra.mxu1 %v3177_v5  ;;  %v1812_v31 = vpop.f32.mrf.mxu1  ;;  %v1770_v54 = vadd.f32 %v1769_v28, %v397_v47  ;;  %v1811_v58 = vadd.f32 %v1810_v29, %v1768_v52  ;;  %v3196_v47 = vld [vmem:[%s3382_s3 + $0x8] sm:$0xff]  }
 0x13f   :  { %2718 = vmatprep.subr.bf16.mxu1 %v3178_v6  ;;  %v2688_v52 = vld [vmem:[#allocation7 + $0x2] ss:$0 sm:$0xff] }
 0x140   :  { %2086 = vmatpush1.bf16.msra.mxu0 %v3168_v60 }
 0x141   :  { %2087 = vmatprep.subr.bf16.mxu0 %v3173_v61  ;;  %v1813_v61 = vadd.f32 %v1812_v31, %v1770_v54 }
 0x142   :  { %2719 = vmatpush3.bf16.msra.mxu1 %v3179_v7 }
 0x143   :  { %2720 = vmatprep.subr.bf16.mxu1 %v3180_v8 }
 0x144   :  { %2088 = vmatpush1.bf16.msra.mxu0 %v3171_v62 }
 0x145   :  { %2745 = vmatprep.subr.bf16.mxu0 %v3296_v19 }
 0x146   :  { %2721 = vmatpush3.bf16.msra.mxu1 %v3181_v9 }
 0x147   :  { %2687 = vmatmul.mubr.msk.bf16.vlgmr.msra.gmra.mxu0 %vm1715_vm2, %v124_v3  ;;  %2722 = vmatprep.subr.bf16.mxu1 %v3182_v10 }
 0x148   :  { %2746 = vmatpush3.bf16.msra.mxu0 %v3190_v18  ;;  %2761 = vmatprep.mubr.msk.bf16.mxu0 %vm3297_vm3, %v3296_v19 }
 0x149   :  { %2747 = vmatprep.subr.bf16.mxu0 %v3296_v19 }
 0x14a   :  { %2723 = vmatpush3.bf16.msra.mxu1 %v3183_v11 }
 0x14b   :  { %2724 = vmatprep.subr.bf16.mxu1 %v3184_v12 }
 0x14c   :  { %2748 = vmatpush3.bf16.msra.mxu0 %v3191_v20 }
 0x14d   :  { %2749 = vmatprep.subr.bf16.mxu0 %v3296_v19 }
 0x14e   :  { %2725 = vmatpush3.bf16.msra.mxu1 %v3185_v13 }
 0x14f   :  { %2726 = vmatprep.subr.bf16.mxu1 %v3186_v14 }
 0x150   :  { %2750 = vmatpush3.bf16.msra.mxu0 %v3192_v21 }
 0x151   :  { %2751 = vmatprep.subr.bf16.mxu0 %v3296_v19 }
 0x152   :  { %2727 = vmatpush3.bf16.msra.mxu1 %v3187_v15 }
 0x153   :  { %2728 = vmatprep.subr.bf16.mxu1 %v3188_v16 }
 0x154   :  { %2752 = vmatpush3.bf16.msra.mxu0 %v3193_v22 }
 0x155   :  { %2753 = vmatprep.subr.bf16.mxu0 %v3296_v19 }
 0x156   :  { %2729 = vmatpush3.bf16.msra.mxu1 %v3189_v17 }
 0x177   :  { %v1849_v30 = vpop.f32.mrf.mxu0 }
 0x178   :  { %v1892_v33 = vpop.f32.mrf.mxu1  ;;  %v1850_v0 = vadd.f32 %v1849_v30, %v1807_v59 }
 0x179   :  { %v1851_v32 = vpop.f32.mrf.mxu0 }
 0x17a   :  { %v1894_v36 = vpop.f32.mrf.mxu1  ;;  %v1852_v62 = vadd.f32 %v1851_v32, %v1809_v57  ;;  %v1893_v7 = vadd.f32 %v1892_v33, %v1850_v0 }
 0x17b   :  { %v1853_v35 = vpop.f32.mrf.mxu0 }
 0x17c   :  { %v1896_v39 = vpop.f32.mrf.mxu1  ;;  %v1854_v63 = vadd.f32 %v1853_v35, %v1811_v58  ;;  %v1895_v5 = vadd.f32 %v1894_v36, %v1852_v62 }
 0x17d   :  { %v1855_v38 = vpop.f32.mrf.mxu0 }
 0x17e   :  { %v1898_v44 = vpop.f32.mrf.mxu1  ;;  %v1856_v2 = vadd.f32 %v1855_v38, %v1813_v61  ;;  %v1897_v6 = vadd.f32 %v1896_v39, %v1854_v63  ;;  %v2705_v61 = vld [vmem:[#allocation7 + $0x3] ss:$0 sm:$0xff] }
 0x180   :  { %v1899_v8 = vadd.f32 %v1898_v44, %v1856_v2 }
 0x1b7   :  { %v1935_v40 = vpop.f32.mrf.mxu0 }
 0x1b8   :  { %v1936_v11 = vadd.f32 %v1935_v40, %v1893_v7 }
 0x1b9   :  { %v1937_v45 = vpop.f32.mrf.mxu0  ;;  %v1978_v46 = vpop.f32.mrf.mxu1 }
 0x1ba   :  { %v1938_v9 = vadd.f32 %v1937_v45, %v1895_v5  ;;  %v1979_v17 = vadd.f32 %v1978_v46, %v1936_v11  ;;  %v3194_v45 = vld [vmem:[%s3382_s3 + $0x18] sm:$0xff]   ;;  %v3195_v46 = vld [vmem:[%s3382_s3 + $0x10] sm:$0xff]  }
 0x1bb   :  { %v1939_v49 = vpop.f32.mrf.mxu0  ;;  %v1980_v50 = vpop.f32.mrf.mxu1  ;;  %2754 = vmatpush3.bf16.msra.mxu0 %v3194_v45 }
 0x1bc   :  { %v1940_v10 = vadd.f32 %v1939_v49, %v1897_v6  ;;  %v1981_v15 = vadd.f32 %v1980_v50, %v1938_v9  ;;  %2755 = vmatprep.subr.bf16.mxu0 %v3296_v19 }
 0x1bd   :  { %v1941_v55 = vpop.f32.mrf.mxu0  ;;  %v1982_v56 = vpop.f32.mrf.mxu1 }
 0x1be   :  { %v1942_v14 = vadd.f32 %v1941_v55, %v1899_v8  ;;  %v1983_v16 = vadd.f32 %v1982_v56, %v1940_v10 }
 0x1bf   :  { %v1984_v1 = vpop.f32.mrf.mxu1  ;;  %2756 = vmatpush3.bf16.msra.mxu0 %v3195_v46 }
 0x1c0   :  { %v1985_v21 = vadd.f32 %v1984_v1, %v1942_v14  ;;  %2757 = vmatprep.subr.bf16.mxu0 %v3296_v19 }
 0x1c3   :  { %2758 = vmatpush3.bf16.msra.mxu0 %v3196_v47 }
 0x1c4   :  { %2759 = vmatprep.subr.bf16.mxu0 %v3296_v19 }
 0x1c7   :  { %2760 = vmatpush3.bf16.msra.mxu0 %v3197_v48 }
 0x1f7   :  { %v2021_v60 = vpop.f32.mrf.mxu0 }
 0x1f8   :  { %v2022_v24 = vadd.f32 %v2021_v60, %v1979_v17 }
 0x1f9   :  { %v2023_v3 = vpop.f32.mrf.mxu0  ;;  %v2064_v4 = vpop.f32.mrf.mxu1 }
 0x1fa   :  { %v2024_v22 = vadd.f32 %v2023_v3, %v1981_v15  ;;  %v2065_v31 = vadd.f32 %v2064_v4, %v2022_v24 }
 0x1fb   :  { %v2025_v12 = vpop.f32.mrf.mxu0  ;;  %v2066_v13 = vpop.f32.mrf.mxu1 }
 0x1fc   :  { %v2026_v23 = vadd.f32 %v2025_v12, %v1983_v16  ;;  %v2067_v29 = vadd.f32 %v2066_v13, %v2024_v22 }
 0x1fd   :  { %v2027_v18 = vpop.f32.mrf.mxu0  ;;  %v2068_v20 = vpop.f32.mrf.mxu1 }
 0x1fe   :  { %v2028_v26 = vadd.f32 %v2027_v18, %v1985_v21  ;;  %v2069_v30 = vadd.f32 %v2068_v20, %v2026_v23 }
 0x1ff   :  { %v2070_v27 = vpop.f32.mrf.mxu1 }
 0x200   :  { %v2071_v33 = vadd.f32 %v2070_v27, %v2028_v26 }
 0x207   :  { %v2107_v25 = vpop.f32.mrf.mxu0 }
 0x208   :  { %v2108_v36 = vadd.f32 %v2107_v25, %v2065_v31 }
 0x209   :  { %v2109_v28 = vpop.f32.mrf.mxu0 }
 0x20a   :  { %v2110_v34 = vadd.f32 %v2109_v28, %v2067_v29  ;;  %v2116_v42 = vmax.f32 %v2108_v36, 0.0 }
 0x20b   :  { %v2111_v32 = vpop.f32.mrf.mxu0 }
 0x20c   :  { %v2112_v35 = vadd.f32 %v2111_v32, %v2069_v30  ;;  %v2117_v40 = vmax.f32 %v2110_v34, 0.0 }
 0x20d   :  { %v2113_v37 = vpop.f32.mrf.mxu0 }
 0x20e   :  { %v2114_v38 = vadd.f32 %v2113_v37, %v2071_v33  ;;  %v2118_v39 = vmax.f32 %v2112_v35, 0.0 }
 0x210   :  { %v2119_v41 = vmax.f32 %v2114_v38, 0.0  ;;  %v2120_v44 = vpack.c.bf16 %v2118_v39, %v2116_v42 }
 0x212   :  { %v2121_v43 = vpack.c.bf16 %v2119_v41, %v2117_v40 }
 0x214   :  { %2289 = vmatprep.mubr.bf16.mxu1 %v2121_v43 }
 0x215   :  { %2290 = vmatmul.mubr.bf16.vlgmr.msra.gmra.mxu1 %v2120_v44 }
 0x2d5   :  { %v2730_v49 = vpop.f32.mrf.mxu1 }
 0x2d7   :  { %v2731_v50 = vpop.f32.mrf.mxu1 }
 0x2d8   :  { %v2732_v51 = vadd.f32 %v2731_v50, %v2730_v49 }
 0x2d9   :  { %v2733_v53 = vpop.f32.mrf.mxu1 }
 0x2da   :  { %v2292_v55 = vadd.f32 %v2732_v51, %v2688_v52 }
 0x2db   :  { %v2734_v54 = vpop.f32.mrf.mxu1 }
 0x2dc   :  { %v2735_v56 = vadd.f32 %v2734_v54, %v2733_v53  ;;  %v2298_v58 = vmax.f32 %v2292_v55, 0.0 }
 0x2de   :  { %v2295_v57 = vadd.f32 %v2735_v56, %v2688_v52 }
 0x2e0   :  { %v2299_v59 = vmax.f32 %v2295_v57, 0.0 }
 0x2e2   :  { %v2300_v60 = vpack.c.bf16 %v2299_v59, %v2298_v58 }
 0x2e4   :  { %2762 = vmatmul.mubr.bf16.vlgmr.msra.gmra.mxu0 %v2300_v60 }
 0x3a4   :  { %v2406_v62 = vpop.f32.mrf.mxu0 }
 0x3a5   :  { %v2407_v63 = vadd.f32 %v2705_v61, %v2406_v62 }
 0x3a6   :  { %v2763_v0 = vpop.f32.mrf.mxu0 }
 0x3a7   :  { %2414 = vst.msk [vmem:[%s3384_s5] sm:$0xff] %vm2413_vm4, %v2407_v63 }
 0x3a8   :  { %v2409_v19 = vpop.f32.mrf.mxu0 }
 0x3a9   :  { %v2410_v1 = vadd.f32 %v2705_v61, %v2409_v19 }
 0x3aa   :  { %v2764_v2 = vpop.f32.mrf.mxu0 }
 0x3ab   :  { %2415 = vst.msk [vmem:[%s3384_s5 + $0x8] sm:$0xff] %vm2413_vm4, %v2410_v1 }
 0x3ac   :  { %2420 = vsyncpa [#allocation3], 1 }
 0x3ad   :  { %2421 = vsyncpa [#allocation5], 1 }
 0x3ae   :  { %2422 = vsyncpa [#allocation8], 1 }

</bundles_post_ra>
